<compile_context>
chip_gen: v7x
topology: tpu7x:2x2x1
jax: 0.10.0
libtpu: 0.0.40
codegen_flags: <defaults>
</compile_context>

<pallas_src>
import functools

import jax
import jax.numpy as jnp
import numpy as np
from jax.experimental import pallas as pl
from jax.experimental.pallas import tpu as pltpu

EPS = 1e-5
LANE = 128                       # output-channel (lane) padding
SUB = 8                          # sublane granularity for row counts / stores
VMEM_LIMIT_BYTES = 48 * 1024 * 1024


def _rup(x, m):
    return (x + m - 1) // m * m


def _compiler_params():
    return pltpu.CompilerParams(dimension_semantics=("parallel",),
                                vmem_limit_bytes=VMEM_LIMIT_BYTES)


# ---------------------------------------------------------------------------
# Frame geometry: per image, conv outputs live in a flat "frame" of row pitch
# (Wo + 2); columns Wo / Wo+1 of each row are garbage (masked + zeroed).
# ---------------------------------------------------------------------------
def _frame_geom(ho, wo):
    pitch = wo + 2
    mo = _rup(ho * pitch, SUB)
    return pitch, mo


def _frame_masks(ho, wo, mo):
    pitch = wo + 2
    q = jnp.arange(mo)
    valid = ((q % pitch) < wo) & (q < ho * pitch)
    valid = valid.astype(jnp.float32)
    return valid.reshape(1, mo), valid.reshape(mo, 1)


def _build_input_slab(x_nhwc, mo):
    """(N,H,W,C) -> (N,S,C) f32: spatially zero-padded image, rows flattened."""
    n, h, w, c = x_nhwc.shape
    pitch = w + 2
    rows = (h + 2) * pitch
    xp = jnp.pad(x_nhwc, ((0, 0), (1, 1), (1, 1), (0, 0))).reshape(n, rows, c)
    s = _rup(max(rows, mo + 2 * pitch + 2), SUB)
    return jnp.pad(xp, ((0, 0), (0, s - rows), (0, 0))).astype(jnp.float32)


def _build_strided_patches(x_nhwc, stride, mo):
    """Strided conv1 fallback: im2col patches laid out in the output frame."""
    n, h, w, c = x_nhwc.shape
    ho, wo = h // stride, w // stride
    pitch = wo + 2
    xp = jnp.pad(x_nhwc, ((0, 0), (1, 1), (1, 1), (0, 0)))
    taps = []
    for dy in range(3):
        for dx in range(3):
            taps.append(xp[:, dy:dy + stride * ho:stride,
                            dx:dx + stride * wo:stride, :])
    pt = jnp.stack(taps, axis=3).reshape(n, ho, wo, 9 * c)
    pt = jnp.pad(pt, ((0, 0), (0, 0), (0, pitch - wo), (0, 0)))
    pt = pt.reshape(n, ho * pitch, 9 * c)
    pt = jnp.pad(pt, ((0, 0), (0, mo - ho * pitch), (0, 0)))
    return pt.astype(jnp.bfloat16)


def _build_strided_1x1_src(x_nhwc, stride, mo):
    """1x1 projection-shortcut input, laid out in the same output frame."""
    n, h, w, c = x_nhwc.shape
    ho, wo = h // stride, w // stride
    pitch = wo + 2
    xs = x_nhwc[:, ::stride, ::stride, :]
    xs = jnp.pad(xs, ((0, 0), (0, 0), (0, pitch - wo), (0, 0)))
    xs = xs.reshape(n, ho * pitch, c)
    xs = jnp.pad(xs, ((0, 0), (0, mo - ho * pitch), (0, 0)))
    return xs.astype(jnp.bfloat16)


# ---------------------------------------------------------------------------
# Pass A: conv1 via in-kernel tap matmuls (+ fused projection-shortcut stats).
# ---------------------------------------------------------------------------
def _make_conv_frame_kernel(offsets, mo, sc_off):
    def kernel(*refs):
        if sc_off is None:
            x_ref, w_ref, mrow_ref, y_ref, st_ref = refs
        else:
            x_ref, w_ref, ws_ref, mrow_ref, y_ref, st_ref, sts_ref = refs
        acc = None
        for t, off in enumerate(offsets):
            part = jnp.dot(x_ref[0, off:off + mo, :], w_ref[t],
                           preferred_element_type=jnp.float32)
            acc = part if acc is None else acc + part
        y_ref[0] = acc.astype(y_ref.dtype)
        m = mrow_ref[...]
        st_ref[0] = jnp.concatenate(
            [jnp.dot(m, acc, preferred_element_type=jnp.float32),
             jnp.dot(m, acc * acc, preferred_element_type=jnp.float32)], axis=0)
        if sc_off is not None:
            acc_s = jnp.dot(x_ref[0, sc_off:sc_off + mo, :], ws_ref[...],
                            preferred_element_type=jnp.float32)
            sts_ref[0] = jnp.concatenate(
                [jnp.dot(m, acc_s, preferred_element_type=jnp.float32),
                 jnp.dot(m, acc_s * acc_s, preferred_element_type=jnp.float32)],
                axis=0)
    return kernel


def _make_conv_patch_kernel():
    def kernel(p_ref, w_ref, xs_ref, ws_ref, mrow_ref, y_ref, st_ref, sts_ref):
        acc = jnp.dot(p_ref[0], w_ref[...], preferred_element_type=jnp.float32)
        y_ref[0] = acc.astype(y_ref.dtype)
        m = mrow_ref[...]
        st_ref[0] = jnp.concatenate(
            [jnp.dot(m, acc, preferred_element_type=jnp.float32),
             jnp.dot(m, acc * acc, preferred_element_type=jnp.float32)], axis=0)
        acc_s = jnp.dot(xs_ref[0], ws_ref[...], preferred_element_type=jnp.float32)
        sts_ref[0] = jnp.concatenate(
            [jnp.dot(m, acc_s, preferred_element_type=jnp.float32),
             jnp.dot(m, acc_s * acc_s, preferred_element_type=jnp.float32)],
            axis=0)
    return kernel


def _conv1_frame(slab, w_taps, mrow, mo, offsets, ws=None, sc_off=None):
    n, s1, cin = slab.shape
    pp = w_taps.shape[2]
    in_specs = [pl.BlockSpec((1, s1, cin), lambda i: (i, 0, 0)),
                pl.BlockSpec(w_taps.shape, lambda i: (0, 0, 0))]
    inputs = [slab, w_taps]
    out_shape = [jax.ShapeDtypeStruct((n, mo, pp), jnp.bfloat16),
                 jax.ShapeDtypeStruct((n, 2, pp), jnp.float32)]
    out_specs = [pl.BlockSpec((1, mo, pp), lambda i: (i, 0, 0)),
                 pl.BlockSpec((1, 2, pp), lambda i: (i, 0, 0))]
    if ws is not None:
        in_specs.append(pl.BlockSpec(ws.shape, lambda i: (0, 0)))
        inputs.append(ws)
        out_shape.append(jax.ShapeDtypeStruct((n, 2, pp), jnp.float32))
        out_specs.append(pl.BlockSpec((1, 2, pp), lambda i: (i, 0, 0)))
    in_specs.append(pl.BlockSpec(mrow.shape, lambda i: (0, 0)))
    inputs.append(mrow)

    outs = pl.pallas_call(
        _make_conv_frame_kernel(offsets, mo, sc_off if ws is not None else None),
        out_shape=tuple(out_shape),
        grid=(n,),
        in_specs=in_specs,
        out_specs=tuple(out_specs),
        compiler_params=_compiler_params(),
    )(*inputs)
    if ws is not None:
        return outs
    return outs[0], outs[1], None


def _conv1_patch(patches, w_mat, xs, ws, mrow, mo):
    n, _, kd = patches.shape
    pp = w_mat.shape[1]
    cin = xs.shape[2]
    return pl.pallas_call(
        _make_conv_patch_kernel(),
        out_shape=(jax.ShapeDtypeStruct((n, mo, pp), jnp.bfloat16),
                   jax.ShapeDtypeStruct((n, 2, pp), jnp.float32),
                   jax.ShapeDtypeStruct((n, 2, pp), jnp.float32)),
        grid=(n,),
        in_specs=[pl.BlockSpec((1, mo, kd), lambda i: (i, 0, 0)),
                  pl.BlockSpec((kd, pp), lambda i: (0, 0)),
                  pl.BlockSpec((1, mo, cin), lambda i: (i, 0, 0)),
                  pl.BlockSpec((cin, pp), lambda i: (0, 0)),
                  pl.BlockSpec(mrow.shape, lambda i: (0, 0))],
        out_specs=(pl.BlockSpec((1, mo, pp), lambda i: (i, 0, 0)),
                   pl.BlockSpec((1, 2, pp), lambda i: (i, 0, 0)),
                   pl.BlockSpec((1, 2, pp), lambda i: (i, 0, 0))),
        compiler_params=_compiler_params(),
    )(patches, w_mat, xs, ws, mrow)


# ---------------------------------------------------------------------------
# Pass B: BN1 + ReLU fused with conv2 taps (+ BN2 stats).  h1 lives in VMEM.
# ---------------------------------------------------------------------------
def _make_bn_relu_conv_kernel(offsets, mo, l_h, s2):
    def kernel(y1_ref, sc_ref, bi_ref, mcol_ref, mrow_ref, w_ref,
               y2_ref, st_ref, slab_ref):
        h = y1_ref[0].astype(jnp.float32) * sc_ref[...] + bi_ref[...]
        h = jnp.maximum(h, 0.0) * mcol_ref[...]          # zero garbage frame rows
        pp = slab_ref.shape[1]
        slab_ref[0:l_h, :] = jnp.zeros((l_h, pp), slab_ref.dtype)
        slab_ref[l_h:l_h + mo, :] = h
        slab_ref[l_h + mo:, :] = jnp.zeros((s2 - l_h - mo, pp), slab_ref.dtype)
        acc = None
        for t, off in enumerate(offsets):
            part = jnp.dot(slab_ref[off:off + mo, :], w_ref[t],
                           preferred_element_type=jnp.float32)
            acc = part if acc is None else acc + part
        y2_ref[0] = acc.astype(y2_ref.dtype)
        m = mrow_ref[...]
        st_ref[0] = jnp.concatenate(
            [jnp.dot(m, acc, preferred_element_type=jnp.float32),
             jnp.dot(m, acc * acc, preferred_element_type=jnp.float32)], axis=0)
    return kernel


def _bn_relu_conv2(y1, scale, bias, mcol, mrow, w2_taps, mo, pitch):
    n, _, pp = y1.shape
    l_h = _rup(pitch + 1, SUB)                      # aligned scratch write offset
    offsets = [l_h - pitch - 1 + dy * pitch + dx
               for dy in range(3) for dx in range(3)]
    s2 = _rup(mo + l_h + pitch + 2, SUB)
    return pl.pallas_call(
        _make_bn_relu_conv_kernel(offsets, mo, l_h, s2),
        out_shape=(jax.ShapeDtypeStruct((n, mo, pp), jnp.bfloat16),
                   jax.ShapeDtypeStruct((n, 2, pp), jnp.float32)),
        grid=(n,),
        in_specs=[pl.BlockSpec((1, mo, pp), lambda i: (i, 0, 0)),
                  pl.BlockSpec((1, pp), lambda i: (0, 0)),
                  pl.BlockSpec((1, pp), lambda i: (0, 0)),
                  pl.BlockSpec((mo, 1), lambda i: (0, 0)),
                  pl.BlockSpec((1, mo), lambda i: (0, 0)),
                  pl.BlockSpec(w2_taps.shape, lambda i: (0, 0, 0))],
        out_specs=(pl.BlockSpec((1, mo, pp), lambda i: (i, 0, 0)),
                   pl.BlockSpec((1, 2, pp), lambda i: (i, 0, 0))),
        scratch_shapes=[pltpu.VMEM((s2, pp), jnp.float32)],
        compiler_params=_compiler_params(),
    )(y1, scale, bias, mcol, mrow, w2_taps)


# ---------------------------------------------------------------------------
# Pass C: BN2 + shortcut (projection or identity-as-1x1) + ReLU.
# ---------------------------------------------------------------------------
def _make_epilogue_kernel(mo, src_off):
    def kernel(y2_ref, sc_ref, bi_ref, src_ref, ws_ref, ssc_ref, sbi_ref, o_ref):
        v = y2_ref[0].astype(jnp.float32) * sc_ref[...] + bi_ref[...]
        s = jnp.dot(src_ref[0, src_off:src_off + mo, :], ws_ref[...],
                    preferred_element_type=jnp.float32)
        v = v + s * ssc_ref[...] + sbi_ref[...]
        o_ref[0] = jnp.maximum(v, 0.0).astype(o_ref.dtype)
    return kernel


def _epilogue(y2, scale, bias, src, ws, s_scale, s_bias, mo, src_off, out_dtype):
    n, _, pp = y2.shape
    s_rows, cin = src.shape[1], src.shape[2]
    return pl.pallas_call(
        _make_epilogue_kernel(mo, src_off),
        out_shape=jax.ShapeDtypeStruct((n, mo, pp), out_dtype),
        grid=(n,),
        in_specs=[pl.BlockSpec((1, mo, pp), lambda i: (i, 0, 0)),
                  pl.BlockSpec((1, pp), lambda i: (0, 0)),
                  pl.BlockSpec((1, pp), lambda i: (0, 0)),
                  pl.BlockSpec((1, s_rows, cin), lambda i: (i, 0, 0)),
                  pl.BlockSpec((cin, pp), lambda i: (0, 0)),
                  pl.BlockSpec((1, pp), lambda i: (0, 0)),
                  pl.BlockSpec((1, pp), lambda i: (0, 0))],
        out_specs=pl.BlockSpec((1, mo, pp), lambda i: (i, 0, 0)),
        compiler_params=_compiler_params(),
    )(y2, scale, bias, src, ws, s_scale, s_bias)


# ---------------------------------------------------------------------------
# Plain-JAX glue: BN folding, parameter preparation, forward.
# ---------------------------------------------------------------------------
def _fold_bn(stats, count, gamma_pad, beta_pad):
    tot = jnp.sum(stats, axis=0)                      # (2, pp)
    mean = tot[0] / count
    # NOTE: single-pass E[x^2]-E[x]^2 in f32 (clamped); adequate for conv
    # activations here.  gamma is zero-padded so padded lanes get scale 0.
    var = jnp.maximum(tot[1] / count - mean * mean, 0.0)
    scale = gamma_pad * jax.lax.rsqrt(var + EPS)
    bias = beta_pad - mean * scale
    return scale.reshape(1, -1), bias.reshape(1, -1)


def _pad_vec(v, pp):
    return jnp.pad(v.astype(jnp.float32), (0, pp - v.shape[0]))


def _tap_weights_3x3(w, pp, cin_pad, dtype):
    o, i, _, _ = w.shape
    wt = jnp.transpose(w, (2, 3, 1, 0)).reshape(9, i, o)
    wt = jnp.pad(wt, ((0, 0), (0, cin_pad - i), (0, pp - o)))
    return wt.astype(dtype)


def _patch_weights_3x3(w, pp, dtype):
    o, i, _, _ = w.shape
    wm = jnp.transpose(w, (2, 3, 1, 0)).reshape(9 * i, o)
    return jnp.pad(wm, ((0, 0), (0, pp - o))).astype(dtype)


def init_params(key, in_planes, planes, stride):
    k1, k2, k3, k4, k5 = jax.random.split(key, 5)
    params = {
        "w1": 0.1 * jax.random.normal(k1, (planes, in_planes, 3, 3), jnp.float32),
        "g1": 1.0 + 0.1 * jax.random.normal(k4, (planes,), jnp.float32),
        "b1": 0.1 * jax.random.normal(k5, (planes,), jnp.float32),
        "w2": 0.1 * jax.random.normal(k2, (planes, planes, 3, 3), jnp.float32),
        "g2": jnp.ones((planes,), jnp.float32),
        "b2": jnp.zeros((planes,), jnp.float32),
    }
    if stride != 1 or in_planes != planes:
        params["ws"] = 0.1 * jax.random.normal(
            k3, (planes, in_planes, 1, 1), jnp.float32)
        params["gs"] = jnp.ones((planes,), jnp.float32)
        params["bs"] = jnp.zeros((planes,), jnp.float32)
    return params


def prepare_params(params, stride):
    """One-time weight/scale preprocessing (hoisted out of the jitted forward)."""
    planes, in_planes = params["w1"].shape[0], params["w1"].shape[1]
    pp = _rup(planes, LANE)
    prep = {
        "w2": _tap_weights_3x3(params["w2"], pp, pp, jnp.float32),
        "g1": _pad_vec(params["g1"], pp), "b1": _pad_vec(params["b1"], pp),
        "g2": _pad_vec(params["g2"], pp), "b2": _pad_vec(params["b2"], pp),
    }
    if stride == 1:
        prep["w1"] = _tap_weights_3x3(params["w1"], pp, in_planes, jnp.float32)
    else:
        prep["w1"] = _patch_weights_3x3(params["w1"], pp, jnp.bfloat16)
    if "ws" in params:
        wsm = jnp.transpose(params["ws"][:, :, 0, 0], (1, 0))
        wsm = jnp.pad(wsm, ((0, 0), (0, pp - planes)))
        prep["ws"] = wsm.astype(jnp.float32 if stride == 1 else jnp.bfloat16)
        prep["gs"] = _pad_vec(params["gs"], pp)
        prep["bs"] = _pad_vec(params["bs"], pp)
    else:
        eye = jnp.eye(in_planes, dtype=jnp.float32)
        prep["ws"] = jnp.pad(eye, ((0, 0), (0, pp - in_planes)))
    return prep


@functools.partial(jax.jit, static_argnames=("stride", "planes", "out_dtype"))
def basic_block_forward(x_nchw, prep, *, stride, planes, out_dtype=jnp.float32):
    x = jnp.transpose(x_nchw, (0, 2, 3, 1)).astype(jnp.float32)   # NCHW -> NHWC
    n, h, w, cin = x.shape
    ho, wo = h // stride, w // stride
    pp = _rup(planes, LANE)
    pitch, mo = _frame_geom(ho, wo)
    count = float(n * ho * wo)
    has_proj = "gs" in prep
    mrow, mcol = _frame_masks(ho, wo, mo)
    offsets1 = [dy * pitch + dx for dy in range(3) for dx in range(3)]

    # ---- Pass A: conv1 (+ projection-shortcut stats) ----
    if stride == 1:
        slab1 = _build_input_slab(x, mo)                  # (N, S1, cin) f32
        if has_proj:
            y1, st1, sts = _conv1_frame(slab1, prep["w1"], mrow, mo, offsets1,
                                        ws=prep["ws"], sc_off=pitch + 1)
        else:
            y1, st1, sts = _conv1_frame(slab1, prep["w1"], mrow, mo, offsets1)
        sc_src, sc_src_off = slab1, pitch + 1
    else:
        patches = _build_strided_patches(x, stride, mo)   # (N, mo, 9*cin) bf16
        xs = _build_strided_1x1_src(x, stride, mo)        # (N, mo, cin) bf16
        y1, st1, sts = _conv1_patch(patches, prep["w1"], xs, prep["ws"], mrow, mo)
        sc_src, sc_src_off = xs, 0

    scale1, bias1 = _fold_bn(st1, count, prep["g1"], prep["b1"])

    # ---- Pass B: BN1 + ReLU fused with conv2 taps (+ BN2 stats) ----
    y2, st2 = _bn_relu_conv2(y1, scale1, bias1, mcol, mrow, prep["w2"], mo, pitch)
    scale2, bias2 = _fold_bn(st2, count, prep["g2"], prep["b2"])

    # ---- Pass C: BN2 + shortcut + ReLU ----
    if has_proj:
        s_scale, s_bias = _fold_bn(sts, count, prep["gs"], prep["bs"])
    else:
        s_scale = jnp.ones((1, pp), jnp.float32)
        s_bias = jnp.zeros((1, pp), jnp.float32)
    out = _epilogue(y2, scale2, bias2, sc_src, prep["ws"], s_scale, s_bias,
                    mo, sc_src_off, out_dtype)

    out = out[:, :ho * pitch, :planes].reshape(n, ho, pitch, planes)[:, :, :wo, :]
    return jnp.transpose(out, (0, 3, 1, 2)).astype(jnp.float32)   # NHWC -> NCHW


# ---------------------------------------------------------------------------
# Pure-JAX reference (mirrors the kernel's bf16 intermediates) for correctness.
# ---------------------------------------------------------------------------
def _conv_ref(x, w, stride, pad):
    return jax.lax.conv_general_dilated(
        x.astype(jnp.bfloat16), w.astype(jnp.bfloat16),
        (stride, stride), [(pad, pad), (pad, pad)],
        dimension_numbers=("NCHW", "OIHW", "NCHW"),
        preferred_element_type=jnp.float32)


def _bn_ref(y, g, b):
    mean = y.mean(axis=(0, 2, 3), keepdims=True)
    var = jnp.square(y - mean).mean(axis=(0, 2, 3), keepdims=True)
    yn = (y - mean) * jax.lax.rsqrt(var + EPS)
    return yn * g.reshape(1, -1, 1, 1) + b.reshape(1, -1, 1, 1)


def reference_forward(x, params, stride):
    y1 = _conv_ref(x, params["w1"], stride, 1)
    y1 = y1.astype(jnp.bfloat16).astype(jnp.float32)   # kernel stores y1 in bf16
    h1 = jax.nn.relu(_bn_ref(y1, params["g1"], params["b1"]))
    y2 = _conv_ref(h1, params["w2"], 1, 1)
    y2 = y2.astype(jnp.bfloat16).astype(jnp.float32)   # kernel stores y2 in bf16
    out = _bn_ref(y2, params["g2"], params["b2"])
    if "ws" in params:
        sc = _bn_ref(_conv_ref(x, params["ws"], stride, 0),
                     params["gs"], params["bs"])
    else:
        sc = x
    return jax.nn.relu(out + sc)


if __name__ == "__main__":
    key = jax.random.PRNGKey(0)

    configs = [
        # (in_planes, planes, stride, H, W)
        (4, 8, 2, 16, 16),   # projection shortcut, stride 2 (patch fallback path)
        (4, 8, 1, 16, 16),   # projection shortcut, stride 1 (frame path, fused 1x1)
        (8, 8, 1, 16, 16),   # identity shortcut (frame path)
    ]
    for in_planes, planes, stride, hh, ww in configs:
        kx, kp, key = jax.random.split(key, 3)
        x = jax.random.normal(kx, (2, in_planes, hh, ww), jnp.float32)   # NCHW
        params = init_params(kp, in_planes, planes, stride)
        prep = prepare_params(params, stride)

        out = jax.block_until_ready(
            basic_block_forward(x, prep, stride=stride, planes=planes))
        ref = jax.block_until_ready(reference_forward(x, params, stride))

        assert out.shape == (2, planes, hh // stride, ww // stride), out.shape
        np.testing.assert_allclose(np.asarray(out), np.asarray(ref),
                                   rtol=2e-2, atol=2e-2)

    print("KERNEL_OK")
</pallas_src>

<mosaic_0001>
module attributes {stable_mosaic.version = 11 : i64} {
  func.func @kernel(%arg0: i32, %arg1: memref<1x80x36xbf16, #tpu.memory_space<vmem>>, %arg2: memref<36x128xbf16, #tpu.memory_space<vmem>>, %arg3: memref<1x80x4xbf16, #tpu.memory_space<vmem>>, %arg4: memref<4x128xbf16, #tpu.memory_space<vmem>>, %arg5: memref<1x80xf32, #tpu.memory_space<vmem>>, %arg6: memref<1x80x128xbf16, #tpu.memory_space<vmem>>, %arg7: memref<1x2x128xf32, #tpu.memory_space<vmem>>, %arg8: memref<1x2x128xf32, #tpu.memory_space<vmem>>) attributes {dimension_semantics = [#tpu.dimension_semantics<parallel>], iteration_bounds = array<i64: 2>, scalar_prefetch = 0 : i64, scratch_operands = 0 : i64, tpu.core_type = #tpu.core_type<tc>, window_params = [{transform_indices = @transform_0, window_bounds = array<i64: 1, 80, 36>}, {pipeline_mode = #tpu.pipeline_mode<synchronous>, transform_indices = @transform_1, window_bounds = array<i64: 36, 128>}, {transform_indices = @transform_2, window_bounds = array<i64: 1, 80, 4>}, {pipeline_mode = #tpu.pipeline_mode<synchronous>, transform_indices = @transform_3, window_bounds = array<i64: 4, 128>}, {pipeline_mode = #tpu.pipeline_mode<synchronous>, transform_indices = @transform_4, window_bounds = array<i64: 1, 80>}, {transform_indices = @transform_5, window_bounds = array<i64: 1, 80, 128>}, {transform_indices = @transform_6, window_bounds = array<i64: 1, 2, 128>}, {transform_indices = @transform_7, window_bounds = array<i64: 1, 2, 128>}]} {
    %c0 = arith.constant 0 : index
    %c0_0 = arith.constant 0 : index
    %c0_1 = arith.constant 0 : index
    %0 = vector.load %arg1[%c0, %c0_0, %c0_1] : memref<1x80x36xbf16, #tpu.memory_space<vmem>>, vector<1x80x36xbf16>
    %1 = vector.shape_cast %0 : vector<1x80x36xbf16> to vector<80x36xbf16>
    %c0_2 = arith.constant 0 : index
    %c0_3 = arith.constant 0 : index
    %2 = vector.load %arg2[%c0_2, %c0_3] : memref<36x128xbf16, #tpu.memory_space<vmem>>, vector<36x128xbf16>
    %cst = arith.constant dense<0.000000e+00> : vector<80x128xf32>
    %3 = tpu.matmul %1, %2, %cst {dimension_numbers = #tpu.dot_dimension_numbers<[1], [0], [0], [1], [0, 0, 1, 1], [], []>} : vector<80x36xbf16>, vector<36x128xbf16>, vector<80x128xf32> -> vector<80x128xf32>
    %4 = arith.truncf %3 : vector<80x128xf32> to vector<80x128xbf16>
    %c0_4 = arith.constant 0 : index
    %c0_5 = arith.constant 0 : index
    %c0_6 = arith.constant 0 : index
    %5 = vector.load %arg6[%c0_4, %c0_5, %c0_6] : memref<1x80x128xbf16, #tpu.memory_space<vmem>>, vector<1x80x128xbf16>
    %6 = vector.shape_cast %5 : vector<1x80x128xbf16> to vector<80x128xbf16>
    %7 = vector.shape_cast %4 : vector<80x128xbf16> to vector<1x80x128xbf16>
    tpu.vector_store %arg6[%c0_4, %c0_5, %c0_6], %7 {strides = array<i32>} : memref<1x80x128xbf16, #tpu.memory_space<vmem>>, vector<1x80x128xbf16>,
    %c0_7 = arith.constant 0 : index
    %c0_8 = arith.constant 0 : index
    %8 = vector.load %arg5[%c0_7, %c0_8] : memref<1x80xf32, #tpu.memory_space<vmem>>, vector<1x80xf32>
    %cst_9 = arith.constant dense<0.000000e+00> : vector<1x128xf32>
    %9 = tpu.matmul %8, %3, %cst_9 {dimension_numbers = #tpu.dot_dimension_numbers<[1], [0], [0], [1], [0, 0, 1, 1], [], []>} : vector<1x80xf32>, vector<80x128xf32>, vector<1x128xf32> -> vector<1x128xf32>
    %10 = arith.mulf %3, %3 : vector<80x128xf32>
    %cst_10 = arith.constant dense<0.000000e+00> : vector<1x128xf32>
    %11 = tpu.matmul %8, %10, %cst_10 {dimension_numbers = #tpu.dot_dimension_numbers<[1], [0], [0], [1], [0, 0, 1, 1], [], []>} : vector<1x80xf32>, vector<80x128xf32>, vector<1x128xf32> -> vector<1x128xf32>
    %12 = tpu.concatenate %9, %11 in 0 : vector<1x128xf32>, vector<1x128xf32> -> vector<2x128xf32>
    %c0_11 = arith.constant 0 : index
    %c0_12 = arith.constant 0 : index
    %c0_13 = arith.constant 0 : index
    %13 = vector.load %arg7[%c0_11, %c0_12, %c0_13] : memref<1x2x128xf32, #tpu.memory_space<vmem>>, vector<1x2x128xf32>
    %14 = vector.shape_cast %13 : vector<1x2x128xf32> to vector<2x128xf32>
    %15 = vector.shape_cast %12 : vector<2x128xf32> to vector<1x2x128xf32>
    tpu.vector_store %arg7[%c0_11, %c0_12, %c0_13], %15 {strides = array<i32>} : memref<1x2x128xf32, #tpu.memory_space<vmem>>, vector<1x2x128xf32>,
    %c0_14 = arith.constant 0 : index
    %c0_15 = arith.constant 0 : index
    %c0_16 = arith.constant 0 : index
    %16 = vector.load %arg3[%c0_14, %c0_15, %c0_16] : memref<1x80x4xbf16, #tpu.memory_space<vmem>>, vector<1x80x4xbf16>
    %17 = vector.shape_cast %16 : vector<1x80x4xbf16> to vector<80x4xbf16>
    %c0_17 = arith.constant 0 : index
    %c0_18 = arith.constant 0 : index
    %18 = vector.load %arg4[%c0_17, %c0_18] : memref<4x128xbf16, #tpu.memory_space<vmem>>, vector<4x128xbf16>
    %cst_19 = arith.constant dense<0.000000e+00> : vector<80x128xf32>
    %19 = tpu.matmul %17, %18, %cst_19 {dimension_numbers = #tpu.dot_dimension_numbers<[1], [0], [0], [1], [0, 0, 1, 1], [], []>} : vector<80x4xbf16>, vector<4x128xbf16>, vector<80x128xf32> -> vector<80x128xf32>
    %cst_20 = arith.constant dense<0.000000e+00> : vector<1x128xf32>
    %20 = tpu.matmul %8, %19, %cst_20 {dimension_numbers = #tpu.dot_dimension_numbers<[1], [0], [0], [1], [0, 0, 1, 1], [], []>} : vector<1x80xf32>, vector<80x128xf32>, vector<1x128xf32> -> vector<1x128xf32>
    %21 = arith.mulf %19, %19 : vector<80x128xf32>
    %cst_21 = arith.constant dense<0.000000e+00> : vector<1x128xf32>
    %22 = tpu.matmul %8, %21, %cst_21 {dimension_numbers = #tpu.dot_dimension_numbers<[1], [0], [0], [1], [0, 0, 1, 1], [], []>} : vector<1x80xf32>, vector<80x128xf32>, vector<1x128xf32> -> vector<1x128xf32>
    %23 = tpu.concatenate %20, %22 in 0 : vector<1x128xf32>, vector<1x128xf32> -> vector<2x128xf32>
    %c0_22 = arith.constant 0 : index
    %c0_23 = arith.constant 0 : index
    %c0_24 = arith.constant 0 : index
    %24 = vector.load %arg8[%c0_22, %c0_23, %c0_24] : memref<1x2x128xf32, #tpu.memory_space<vmem>>, vector<1x2x128xf32>
    %25 = vector.shape_cast %24 : vector<1x2x128xf32> to vector<2x128xf32>
    %26 = vector.shape_cast %23 : vector<2x128xf32> to vector<1x2x128xf32>
    tpu.vector_store %arg8[%c0_22, %c0_23, %c0_24], %26 {strides = array<i32>} : memref<1x2x128xf32, #tpu.memory_space<vmem>>, vector<1x2x128xf32>,
    return
  }
  func.func @transform_0(%arg0: i32) -> (i32, i32, i32) {
    %c0_i32 = arith.constant 0 : i32
    %c0_i32_0 = arith.constant 0 : i32
    %c0_i32_1 = arith.constant 0 : i32
    return %arg0, %c0_i32, %c0_i32_0 : i32, i32, i32
  }
  func.func @transform_1(%arg0: i32) -> (i32, i32) {
    %c0_i32 = arith.constant 0 : i32
    %c0_i32_0 = arith.constant 0 : i32
    %c0_i32_1 = arith.constant 0 : i32
    return %c0_i32, %c0_i32_0 : i32, i32
  }
  func.func @transform_2(%arg0: i32) -> (i32, i32, i32) {
    %c0_i32 = arith.constant 0 : i32
    %c0_i32_0 = arith.constant 0 : i32
    %c0_i32_1 = arith.constant 0 : i32
    return %arg0, %c0_i32, %c0_i32_0 : i32, i32, i32
  }
  func.func @transform_3(%arg0: i32) -> (i32, i32) {
    %c0_i32 = arith.constant 0 : i32
    %c0_i32_0 = arith.constant 0 : i32
    %c0_i32_1 = arith.constant 0 : i32
    return %c0_i32, %c0_i32_0 : i32, i32
  }
  func.func @transform_4(%arg0: i32) -> (i32, i32) {
    %c0_i32 = arith.constant 0 : i32
    %c0_i32_0 = arith.constant 0 : i32
    %c0_i32_1 = arith.constant 0 : i32
    return %c0_i32, %c0_i32_0 : i32, i32
  }
  func.func @transform_5(%arg0: i32) -> (i32, i32, i32) {
    %c0_i32 = arith.constant 0 : i32
    %c0_i32_0 = arith.constant 0 : i32
    %c0_i32_1 = arith.constant 0 : i32
    return %arg0, %c0_i32, %c0_i32_0 : i32, i32, i32
  }
  func.func @transform_6(%arg0: i32) -> (i32, i32, i32) {
    %c0_i32 = arith.constant 0 : i32
    %c0_i32_0 = arith.constant 0 : i32
    %c0_i32_1 = arith.constant 0 : i32
    return %arg0, %c0_i32, %c0_i32_0 : i32, i32, i32
  }
  func.func @transform_7(%arg0: i32) -> (i32, i32, i32) {
    %c0_i32 = arith.constant 0 : i32
    %c0_i32_0 = arith.constant 0 : i32
    %c0_i32_1 = arith.constant 0 : i32
    return %arg0, %c0_i32, %c0_i32_0 : i32, i32, i32
  }
}

module attributes {stable_mosaic.version = 11 : i64} {
  func.func @kernel(%arg0: i32, %arg1: memref<1x80x128xbf16, #tpu.memory_space<vmem>>, %arg2: memref<1x128xf32, #tpu.memory_space<vmem>>, %arg3: memref<1x128xf32, #tpu.memory_space<vmem>>, %arg4: memref<80x1xf32, #tpu.memory_space<vmem>>, %arg5: memref<1x80xf32, #tpu.memory_space<vmem>>, %arg6: memref<9x128x128xf32, #tpu.memory_space<vmem>>, %arg7: memref<1x80x128xbf16, #tpu.memory_space<vmem>>, %arg8: memref<1x2x128xf32, #tpu.memory_space<vmem>>, %arg9: memref<112x128xf32, #tpu.memory_space<vmem>>) attributes {dimension_semantics = [#tpu.dimension_semantics<parallel>], iteration_bounds = array<i64: 2>, scalar_prefetch = 0 : i64, scratch_operands = 1 : i64, tpu.core_type = #tpu.core_type<tc>, window_params = [{transform_indices = @transform_0, window_bounds = array<i64: 1, 80, 128>}, {pipeline_mode = #tpu.pipeline_mode<synchronous>, transform_indices = @transform_1, window_bounds = array<i64: 1, 128>}, {pipeline_mode = #tpu.pipeline_mode<synchronous>, transform_indices = @transform_2, window_bounds = array<i64: 1, 128>}, {pipeline_mode = #tpu.pipeline_mode<synchronous>, transform_indices = @transform_3, window_bounds = array<i64: 80, 1>}, {pipeline_mode = #tpu.pipeline_mode<synchronous>, transform_indices = @transform_4, window_bounds = array<i64: 1, 80>}, {pipeline_mode = #tpu.pipeline_mode<synchronous>, transform_indices = @transform_5, window_bounds = array<i64: 9, 128, 128>}, {transform_indices = @transform_6, window_bounds = array<i64: 1, 80, 128>}, {transform_indices = @transform_7, window_bounds = array<i64: 1, 2, 128>}]} {
    %c0 = arith.constant 0 : index
    %c0_0 = arith.constant 0 : index
    %c0_1 = arith.constant 0 : index
    %0 = vector.load %arg1[%c0, %c0_0, %c0_1] : memref<1x80x128xbf16, #tpu.memory_space<vmem>>, vector<1x80x128xbf16>
    %1 = vector.shape_cast %0 : vector<1x80x128xbf16> to vector<80x128xbf16>
    %2 = arith.extf %1 : vector<80x128xbf16> to vector<80x128xf32>
    %c0_2 = arith.constant 0 : index
    %c0_3 = arith.constant 0 : index
    %3 = vector.load %arg2[%c0_2, %c0_3] : memref<1x128xf32, #tpu.memory_space<vmem>>, vector<1x128xf32>
    %4 = vector.broadcast %3 : vector<1x128xf32> to vector<80x128xf32>
    %5 = arith.mulf %2, %4 : vector<80x128xf32>
    %c0_4 = arith.constant 0 : index
    %c0_5 = arith.constant 0 : index
    %6 = vector.load %arg3[%c0_4, %c0_5] : memref<1x128xf32, #tpu.memory_space<vmem>>, vector<1x128xf32>
    %7 = vector.broadcast %6 : vector<1x128xf32> to vector<80x128xf32>
    %8 = arith.addf %5, %7 : vector<80x128xf32>
    %cst = arith.constant 0.000000e+00 : f32
    %9 = vector.broadcast %cst : f32 to vector<80x128xf32>
    %10 = arith.maximumf %8, %9 : vector<80x128xf32>
    %c0_6 = arith.constant 0 : index
    %c0_7 = arith.constant 0 : index
    %11 = vector.load %arg4[%c0_6, %c0_7] : memref<80x1xf32, #tpu.memory_space<vmem>>, vector<80x1xf32>
    %12 = vector.broadcast %11 : vector<80x1xf32> to vector<80x128xf32>
    %13 = arith.mulf %10, %12 : vector<80x128xf32>
    %cst_8 = arith.constant 0.000000e+00 : f32
    %14 = vector.broadcast %cst_8 : f32 to vector<16x128xf32>
    %c0_9 = arith.constant 0 : index
    %c0_10 = arith.constant 0 : index
    %15 = vector.load %arg9[%c0_9, %c0_10] : memref<112x128xf32, #tpu.memory_space<vmem>>, vector<16x128xf32>
    tpu.vector_store %arg9[%c0_9, %c0_10], %14 {strides = array<i32>} : memref<112x128xf32, #tpu.memory_space<vmem>>, vector<16x128xf32>,
    %c16 = arith.constant 16 : index
    %c0_11 = arith.constant 0 : index
    %16 = vector.load %arg9[%c16, %c0_11] : memref<112x128xf32, #tpu.memory_space<vmem>>, vector<80x128xf32>
    tpu.vector_store %arg9[%c16, %c0_11], %13 {strides = array<i32>} : memref<112x128xf32, #tpu.memory_space<vmem>>, vector<80x128xf32>,
    %cst_12 = arith.constant 0.000000e+00 : f32
    %17 = vector.broadcast %cst_12 : f32 to vector<16x128xf32>
    %c96 = arith.constant 96 : index
    %c0_13 = arith.constant 0 : index
    %18 = vector.load %arg9[%c96, %c0_13] : memref<112x128xf32, #tpu.memory_space<vmem>>, vector<16x128xf32>
    tpu.vector_store %arg9[%c96, %c0_13], %17 {strides = array<i32>} : memref<112x128xf32, #tpu.memory_space<vmem>>, vector<16x128xf32>,
    %c5 = arith.constant 5 : index
    %c0_14 = arith.constant 0 : index
    %19 = vector.load %arg9[%c5, %c0_14] : memref<112x128xf32, #tpu.memory_space<vmem>>, vector<80x128xf32>
    %c0_15 = arith.constant 0 : index
    %c0_16 = arith.constant 0 : index
    %c0_17 = arith.constant 0 : index
    %20 = vector.load %arg6[%c0_15, %c0_16, %c0_17] : memref<9x128x128xf32, #tpu.memory_space<vmem>>, vector<1x128x128xf32>
    %21 = vector.shape_cast %20 : vector<1x128x128xf32> to vector<128x128xf32>
    %cst_18 = arith.constant dense<0.000000e+00> : vector<80x128xf32>
    %22 = tpu.matmul %19, %21, %cst_18 {dimension_numbers = #tpu.dot_dimension_numbers<[1], [0], [0], [1], [0, 0, 1, 1], [], []>} : vector<80x128xf32>, vector<128x128xf32>, vector<80x128xf32> -> vector<80x128xf32>
    %c6 = arith.constant 6 : index
    %c0_19 = arith.constant 0 : index
    %23 = vector.load %arg9[%c6, %c0_19] : memref<112x128xf32, #tpu.memory_space<vmem>>, vector<80x128xf32>
    %c1 = arith.constant 1 : index
    %c0_20 = arith.constant 0 : index
    %c0_21 = arith.constant 0 : index
    %24 = vector.load %arg6[%c1, %c0_20, %c0_21] : memref<9x128x128xf32, #tpu.memory_space<vmem>>, vector<1x128x128xf32>
    %25 = vector.shape_cast %24 : vector<1x128x128xf32> to vector<128x128xf32>
    %cst_22 = arith.constant dense<0.000000e+00> : vector<80x128xf32>
    %26 = tpu.matmul %23, %25, %cst_22 {dimension_numbers = #tpu.dot_dimension_numbers<[1], [0], [0], [1], [0, 0, 1, 1], [], []>} : vector<80x128xf32>, vector<128x128xf32>, vector<80x128xf32> -> vector<80x128xf32>
    %27 = arith.addf %22, %26 : vector<80x128xf32>
    %c7 = arith.constant 7 : index
    %c0_23 = arith.constant 0 : index
    %28 = vector.load %arg9[%c7, %c0_23] : memref<112x128xf32, #tpu.memory_space<vmem>>, vector<80x128xf32>
    %c2 = arith.constant 2 : index
    %c0_24 = arith.constant 0 : index
    %c0_25 = arith.constant 0 : index
    %29 = vector.load %arg6[%c2, %c0_24, %c0_25] : memref<9x128x128xf32, #tpu.memory_space<vmem>>, vector<1x128x128xf32>
    %30 = vector.shape_cast %29 : vector<1x128x128xf32> to vector<128x128xf32>
    %cst_26 = arith.constant dense<0.000000e+00> : vector<80x128xf32>
    %31 = tpu.matmul %28, %30, %cst_26 {dimension_numbers = #tpu.dot_dimension_numbers<[1], [0], [0], [1], [0, 0, 1, 1], [], []>} : vector<80x128xf32>, vector<128x128xf32>, vector<80x128xf32> -> vector<80x128xf32>
    %32 = arith.addf %27, %31 : vector<80x128xf32>
    %c15 = arith.constant 15 : index
    %c0_27 = arith.constant 0 : index
    %33 = vector.load %arg9[%c15, %c0_27] : memref<112x128xf32, #tpu.memory_space<vmem>>, vector<80x128xf32>
    %c3 = arith.constant 3 : index
    %c0_28 = arith.constant 0 : index
    %c0_29 = arith.constant 0 : index
    %34 = vector.load %arg6[%c3, %c0_28, %c0_29] : memref<9x128x128xf32, #tpu.memory_space<vmem>>, vector<1x128x128xf32>
    %35 = vector.shape_cast %34 : vector<1x128x128xf32> to vector<128x128xf32>
    %cst_30 = arith.constant dense<0.000000e+00> : vector<80x128xf32>
    %36 = tpu.matmul %33, %35, %cst_30 {dimension_numbers = #tpu.dot_dimension_numbers<[1], [0], [0], [1], [0, 0, 1, 1], [], []>} : vector<80x128xf32>, vector<128x128xf32>, vector<80x128xf32> -> vector<80x128xf32>
    %37 = arith.addf %32, %36 : vector<80x128xf32>
    %c16_31 = arith.constant 16 : index
    %c0_32 = arith.constant 0 : index
    %38 = vector.load %arg9[%c16_31, %c0_32] : memref<112x128xf32, #tpu.memory_space<vmem>>, vector<80x128xf32>
    %c4 = arith.constant 4 : index
    %c0_33 = arith.constant 0 : index
    %c0_34 = arith.constant 0 : index
    %39 = vector.load %arg6[%c4, %c0_33, %c0_34] : memref<9x128x128xf32, #tpu.memory_space<vmem>>, vector<1x128x128xf32>
    %40 = vector.shape_cast %39 : vector<1x128x128xf32> to vector<128x128xf32>
    %cst_35 = arith.constant dense<0.000000e+00> : vector<80x128xf32>
    %41 = tpu.matmul %38, %40, %cst_35 {dimension_numbers = #tpu.dot_dimension_numbers<[1], [0], [0], [1], [0, 0, 1, 1], [], []>} : vector<80x128xf32>, vector<128x128xf32>, vector<80x128xf32> -> vector<80x128xf32>
    %42 = arith.addf %37, %41 : vector<80x128xf32>
    %c17 = arith.constant 17 : index
    %c0_36 = arith.constant 0 : index
    %43 = vector.load %arg9[%c17, %c0_36] : memref<112x128xf32, #tpu.memory_space<vmem>>, vector<80x128xf32>
    %c5_37 = arith.constant 5 : index
    %c0_38 = arith.constant 0 : index
    %c0_39 = arith.constant 0 : index
    %44 = vector.load %arg6[%c5_37, %c0_38, %c0_39] : memref<9x128x128xf32, #tpu.memory_space<vmem>>, vector<1x128x128xf32>
    %45 = vector.shape_cast %44 : vector<1x128x128xf32> to vector<128x128xf32>
    %cst_40 = arith.constant dense<0.000000e+00> : vector<80x128xf32>
    %46 = tpu.matmul %43, %45, %cst_40 {dimension_numbers = #tpu.dot_dimension_numbers<[1], [0], [0], [1], [0, 0, 1, 1], [], []>} : vector<80x128xf32>, vector<128x128xf32>, vector<80x128xf32> -> vector<80x128xf32>
    %47 = arith.addf %42, %46 : vector<80x128xf32>
    %c25 = arith.constant 25 : index
    %c0_41 = arith.constant 0 : index
    %48 = vector.load %arg9[%c25, %c0_41] : memref<112x128xf32, #tpu.memory_space<vmem>>, vector<80x128xf32>
    %c6_42 = arith.constant 6 : index
    %c0_43 = arith.constant 0 : index
    %c0_44 = arith.constant 0 : index
    %49 = vector.load %arg6[%c6_42, %c0_43, %c0_44] : memref<9x128x128xf32, #tpu.memory_space<vmem>>, vector<1x128x128xf32>
    %50 = vector.shape_cast %49 : vector<1x128x128xf32> to vector<128x128xf32>
    %cst_45 = arith.constant dense<0.000000e+00> : vector<80x128xf32>
    %51 = tpu.matmul %48, %50, %cst_45 {dimension_numbers = #tpu.dot_dimension_numbers<[1], [0], [0], [1], [0, 0, 1, 1], [], []>} : vector<80x128xf32>, vector<128x128xf32>, vector<80x128xf32> -> vector<80x128xf32>
    %52 = arith.addf %47, %51 : vector<80x128xf32>
    %c26 = arith.constant 26 : index
    %c0_46 = arith.constant 0 : index
    %53 = vector.load %arg9[%c26, %c0_46] : memref<112x128xf32, #tpu.memory_space<vmem>>, vector<80x128xf32>
    %c7_47 = arith.constant 7 : index
    %c0_48 = arith.constant 0 : index
    %c0_49 = arith.constant 0 : index
    %54 = vector.load %arg6[%c7_47, %c0_48, %c0_49] : memref<9x128x128xf32, #tpu.memory_space<vmem>>, vector<1x128x128xf32>
    %55 = vector.shape_cast %54 : vector<1x128x128xf32> to vector<128x128xf32>
    %cst_50 = arith.constant dense<0.000000e+00> : vector<80x128xf32>
    %56 = tpu.matmul %53, %55, %cst_50 {dimension_numbers = #tpu.dot_dimension_numbers<[1], [0], [0], [1], [0, 0, 1, 1], [], []>} : vector<80x128xf32>, vector<128x128xf32>, vector<80x128xf32> -> vector<80x128xf32>
    %57 = arith.addf %52, %56 : vector<80x128xf32>
    %c27 = arith.constant 27 : index
    %c0_51 = arith.constant 0 : index
    %58 = vector.load %arg9[%c27, %c0_51] : memref<112x128xf32, #tpu.memory_space<vmem>>, vector<80x128xf32>
    %c8 = arith.constant 8 : index
    %c0_52 = arith.constant 0 : index
    %c0_53 = arith.constant 0 : index
    %59 = vector.load %arg6[%c8, %c0_52, %c0_53] : memref<9x128x128xf32, #tpu.memory_space<vmem>>, vector<1x128x128xf32>
    %60 = vector.shape_cast %59 : vector<1x128x128xf32> to vector<128x128xf32>
    %cst_54 = arith.constant dense<0.000000e+00> : vector<80x128xf32>
    %61 = tpu.matmul %58, %60, %cst_54 {dimension_numbers = #tpu.dot_dimension_numbers<[1], [0], [0], [1], [0, 0, 1, 1], [], []>} : vector<80x128xf32>, vector<128x128xf32>, vector<80x128xf32> -> vector<80x128xf32>
    %62 = arith.addf %57, %61 : vector<80x128xf32>
    %63 = arith.truncf %62 : vector<80x128xf32> to vector<80x128xbf16>
    %c0_55 = arith.constant 0 : index
    %c0_56 = arith.constant 0 : index
    %c0_57 = arith.constant 0 : index
    %64 = vector.load %arg7[%c0_55, %c0_56, %c0_57] : memref<1x80x128xbf16, #tpu.memory_space<vmem>>, vector<1x80x128xbf16>
    %65 = vector.shape_cast %64 : vector<1x80x128xbf16> to vector<80x128xbf16>
    %66 = vector.shape_cast %63 : vector<80x128xbf16> to vector<1x80x128xbf16>
    tpu.vector_store %arg7[%c0_55, %c0_56, %c0_57], %66 {strides = array<i32>} : memref<1x80x128xbf16, #tpu.memory_space<vmem>>, vector<1x80x128xbf16>,
    %c0_58 = arith.constant 0 : index
    %c0_59 = arith.constant 0 : index
    %67 = vector.load %arg5[%c0_58, %c0_59] : memref<1x80xf32, #tpu.memory_space<vmem>>, vector<1x80xf32>
    %cst_60 = arith.constant dense<0.000000e+00> : vector<1x128xf32>
    %68 = tpu.matmul %67, %62, %cst_60 {dimension_numbers = #tpu.dot_dimension_numbers<[1], [0], [0], [1], [0, 0, 1, 1], [], []>} : vector<1x80xf32>, vector<80x128xf32>, vector<1x128xf32> -> vector<1x128xf32>
    %69 = arith.mulf %62, %62 : vector<80x128xf32>
    %cst_61 = arith.constant dense<0.000000e+00> : vector<1x128xf32>
    %70 = tpu.matmul %67, %69, %cst_61 {dimension_numbers = #tpu.dot_dimension_numbers<[1], [0], [0], [1], [0, 0, 1, 1], [], []>} : vector<1x80xf32>, vector<80x128xf32>, vector<1x128xf32> -> vector<1x128xf32>
    %71 = tpu.concatenate %68, %70 in 0 : vector<1x128xf32>, vector<1x128xf32> -> vector<2x128xf32>
    %c0_62 = arith.constant 0 : index
    %c0_63 = arith.constant 0 : index
    %c0_64 = arith.constant 0 : index
    %72 = vector.load %arg8[%c0_62, %c0_63, %c0_64] : memref<1x2x128xf32, #tpu.memory_space<vmem>>, vector<1x2x128xf32>
    %73 = vector.shape_cast %72 : vector<1x2x128xf32> to vector<2x128xf32>
    %74 = vector.shape_cast %71 : vector<2x128xf32> to vector<1x2x128xf32>
    tpu.vector_store %arg8[%c0_62, %c0_63, %c0_64], %74 {strides = array<i32>} : memref<1x2x128xf32, #tpu.memory_space<vmem>>, vector<1x2x128xf32>,
    return
  }
  func.func @transform_0(%arg0: i32) -> (i32, i32, i32) {
    %c0_i32 = arith.constant 0 : i32
    %c0_i32_0 = arith.constant 0 : i32
    %c0_i32_1 = arith.constant 0 : i32
    return %arg0, %c0_i32, %c0_i32_0 : i32, i32, i32
  }
  func.func @transform_1(%arg0: i32) -> (i32, i32) {
    %c0_i32 = arith.constant 0 : i32
    %c0_i32_0 = arith.constant 0 : i32
    %c0_i32_1 = arith.constant 0 : i32
    return %c0_i32, %c0_i32_0 : i32, i32
  }
  func.func @transform_2(%arg0: i32) -> (i32, i32) {
    %c0_i32 = arith.constant 0 : i32
    %c0_i32_0 = arith.constant 0 : i32
    %c0_i32_1 = arith.constant 0 : i32
    return %c0_i32, %c0_i32_0 : i32, i32
  }
  func.func @transform_3(%arg0: i32) -> (i32, i32) {
    %c0_i32 = arith.constant 0 : i32
    %c0_i32_0 = arith.constant 0 : i32
    %c0_i32_1 = arith.constant 0 : i32
    return %c0_i32, %c0_i32_0 : i32, i32
  }
  func.func @transform_4(%arg0: i32) -> (i32, i32) {
    %c0_i32 = arith.constant 0 : i32
    %c0_i32_0 = arith.constant 0 : i32
    %c0_i32_1 = arith.constant 0 : i32
    return %c0_i32, %c0_i32_0 : i32, i32
  }
  func.func @transform_5(%arg0: i32) -> (i32, i32, i32) {
    %c0_i32 = arith.constant 0 : i32
    %c0_i32_0 = arith.constant 0 : i32
    %c0_i32_1 = arith.constant 0 : i32
    %c0_i32_2 = arith.constant 0 : i32
    return %c0_i32, %c0_i32_0, %c0_i32_1 : i32, i32, i32
  }
  func.func @transform_6(%arg0: i32) -> (i32, i32, i32) {
    %c0_i32 = arith.constant 0 : i32
    %c0_i32_0 = arith.constant 0 : i32
    %c0_i32_1 = arith.constant 0 : i32
    return %arg0, %c0_i32, %c0_i32_0 : i32, i32, i32
  }
  func.func @transform_7(%arg0: i32) -> (i32, i32, i32) {
    %c0_i32 = arith.constant 0 : i32
    %c0_i32_0 = arith.constant 0 : i32
    %c0_i32_1 = arith.constant 0 : i32
    return %arg0, %c0_i32, %c0_i32_0 : i32, i32, i32
  }
}

module attributes {stable_mosaic.version = 11 : i64} {
  func.func @kernel(%arg0: i32, %arg1: memref<1x80x128xbf16, #tpu.memory_space<vmem>>, %arg2: memref<1x128xf32, #tpu.memory_space<vmem>>, %arg3: memref<1x128xf32, #tpu.memory_space<vmem>>, %arg4: memref<1x80x4xbf16, #tpu.memory_space<vmem>>, %arg5: memref<4x128xbf16, #tpu.memory_space<vmem>>, %arg6: memref<1x128xf32, #tpu.memory_space<vmem>>, %arg7: memref<1x128xf32, #tpu.memory_space<vmem>>, %arg8: memref<1x80x128xf32, #tpu.memory_space<vmem>>) attributes {dimension_semantics = [#tpu.dimension_semantics<parallel>], iteration_bounds = array<i64: 2>, scalar_prefetch = 0 : i64, scratch_operands = 0 : i64, tpu.core_type = #tpu.core_type<tc>, window_params = [{transform_indices = @transform_0, window_bounds = array<i64: 1, 80, 128>}, {pipeline_mode = #tpu.pipeline_mode<synchronous>, transform_indices = @transform_1, window_bounds = array<i64: 1, 128>}, {pipeline_mode = #tpu.pipeline_mode<synchronous>, transform_indices = @transform_2, window_bounds = array<i64: 1, 128>}, {transform_indices = @transform_3, window_bounds = array<i64: 1, 80, 4>}, {pipeline_mode = #tpu.pipeline_mode<synchronous>, transform_indices = @transform_4, window_bounds = array<i64: 4, 128>}, {pipeline_mode = #tpu.pipeline_mode<synchronous>, transform_indices = @transform_5, window_bounds = array<i64: 1, 128>}, {pipeline_mode = #tpu.pipeline_mode<synchronous>, transform_indices = @transform_6, window_bounds = array<i64: 1, 128>}, {transform_indices = @transform_7, window_bounds = array<i64: 1, 80, 128>}]} {
    %c0 = arith.constant 0 : index
    %c0_0 = arith.constant 0 : index
    %c0_1 = arith.constant 0 : index
    %0 = vector.load %arg1[%c0, %c0_0, %c0_1] : memref<1x80x128xbf16, #tpu.memory_space<vmem>>, vector<1x80x128xbf16>
    %1 = vector.shape_cast %0 : vector<1x80x128xbf16> to vector<80x128xbf16>
    %2 = arith.extf %1 : vector<80x128xbf16> to vector<80x128xf32>
    %c0_2 = arith.constant 0 : index
    %c0_3 = arith.constant 0 : index
    %3 = vector.load %arg2[%c0_2, %c0_3] : memref<1x128xf32, #tpu.memory_space<vmem>>, vector<1x128xf32>
    %4 = vector.broadcast %3 : vector<1x128xf32> to vector<80x128xf32>
    %5 = arith.mulf %2, %4 : vector<80x128xf32>
    %c0_4 = arith.constant 0 : index
    %c0_5 = arith.constant 0 : index
    %6 = vector.load %arg3[%c0_4, %c0_5] : memref<1x128xf32, #tpu.memory_space<vmem>>, vector<1x128xf32>
    %7 = vector.broadcast %6 : vector<1x128xf32> to vector<80x128xf32>
    %8 = arith.addf %5, %7 : vector<80x128xf32>
    %c0_6 = arith.constant 0 : index
    %c0_7 = arith.constant 0 : index
    %c0_8 = arith.constant 0 : index
    %9 = vector.load %arg4[%c0_6, %c0_7, %c0_8] : memref<1x80x4xbf16, #tpu.memory_space<vmem>>, vector<1x80x4xbf16>
    %10 = vector.shape_cast %9 : vector<1x80x4xbf16> to vector<80x4xbf16>
    %c0_9 = arith.constant 0 : index
    %c0_10 = arith.constant 0 : index
    %11 = vector.load %arg5[%c0_9, %c0_10] : memref<4x128xbf16, #tpu.memory_space<vmem>>, vector<4x128xbf16>
    %cst = arith.constant dense<0.000000e+00> : vector<80x128xf32>
    %12 = tpu.matmul %10, %11, %cst {dimension_numbers = #tpu.dot_dimension_numbers<[1], [0], [0], [1], [0, 0, 1, 1], [], []>} : vector<80x4xbf16>, vector<4x128xbf16>, vector<80x128xf32> -> vector<80x128xf32>
    %c0_11 = arith.constant 0 : index
    %c0_12 = arith.constant 0 : index
    %13 = vector.load %arg6[%c0_11, %c0_12] : memref<1x128xf32, #tpu.memory_space<vmem>>, vector<1x128xf32>
    %14 = vector.broadcast %13 : vector<1x128xf32> to vector<80x128xf32>
    %15 = arith.mulf %12, %14 : vector<80x128xf32>
    %16 = arith.addf %8, %15 : vector<80x128xf32>
    %c0_13 = arith.constant 0 : index
    %c0_14 = arith.constant 0 : index
    %17 = vector.load %arg7[%c0_13, %c0_14] : memref<1x128xf32, #tpu.memory_space<vmem>>, vector<1x128xf32>
    %18 = vector.broadcast %17 : vector<1x128xf32> to vector<80x128xf32>
    %19 = arith.addf %16, %18 : vector<80x128xf32>
    %cst_15 = arith.constant 0.000000e+00 : f32
    %20 = vector.broadcast %cst_15 : f32 to vector<80x128xf32>
    %21 = arith.maximumf %19, %20 : vector<80x128xf32>
    %c0_16 = arith.constant 0 : index
    %c0_17 = arith.constant 0 : index
    %c0_18 = arith.constant 0 : index
    %22 = vector.load %arg8[%c0_16, %c0_17, %c0_18] : memref<1x80x128xf32, #tpu.memory_space<vmem>>, vector<1x80x128xf32>
    %23 = vector.shape_cast %22 : vector<1x80x128xf32> to vector<80x128xf32>
    %24 = vector.shape_cast %21 : vector<80x128xf32> to vector<1x80x128xf32>
    tpu.vector_store %arg8[%c0_16, %c0_17, %c0_18], %24 {strides = array<i32>} : memref<1x80x128xf32, #tpu.memory_space<vmem>>, vector<1x80x128xf32>,
    return
  }
  func.func @transform_0(%arg0: i32) -> (i32, i32, i32) {
    %c0_i32 = arith.constant 0 : i32
    %c0_i32_0 = arith.constant 0 : i32
    %c0_i32_1 = arith.constant 0 : i32
    return %arg0, %c0_i32, %c0_i32_0 : i32, i32, i32
  }
  func.func @transform_1(%arg0: i32) -> (i32, i32) {
    %c0_i32 = arith.constant 0 : i32
    %c0_i32_0 = arith.constant 0 : i32
    %c0_i32_1 = arith.constant 0 : i32
    return %c0_i32, %c0_i32_0 : i32, i32
  }
  func.func @transform_2(%arg0: i32) -> (i32, i32) {
    %c0_i32 = arith.constant 0 : i32
    %c0_i32_0 = arith.constant 0 : i32
    %c0_i32_1 = arith.constant 0 : i32
    return %c0_i32, %c0_i32_0 : i32, i32
  }
  func.func @transform_3(%arg0: i32) -> (i32, i32, i32) {
    %c0_i32 = arith.constant 0 : i32
    %c0_i32_0 = arith.constant 0 : i32
    %c0_i32_1 = arith.constant 0 : i32
    return %arg0, %c0_i32, %c0_i32_0 : i32, i32, i32
  }
  func.func @transform_4(%arg0: i32) -> (i32, i32) {
    %c0_i32 = arith.constant 0 : i32
    %c0_i32_0 = arith.constant 0 : i32
    %c0_i32_1 = arith.constant 0 : i32
    return %c0_i32, %c0_i32_0 : i32, i32
  }
  func.func @transform_5(%arg0: i32) -> (i32, i32) {
    %c0_i32 = arith.constant 0 : i32
    %c0_i32_0 = arith.constant 0 : i32
    %c0_i32_1 = arith.constant 0 : i32
    return %c0_i32, %c0_i32_0 : i32, i32
  }
  func.func @transform_6(%arg0: i32) -> (i32, i32) {
    %c0_i32 = arith.constant 0 : i32
    %c0_i32_0 = arith.constant 0 : i32
    %c0_i32_1 = arith.constant 0 : i32
    return %c0_i32, %c0_i32_0 : i32, i32
  }
  func.func @transform_7(%arg0: i32) -> (i32, i32, i32) {
    %c0_i32 = arith.constant 0 : i32
    %c0_i32_0 = arith.constant 0 : i32
    %c0_i32_1 = arith.constant 0 : i32
    return %arg0, %c0_i32, %c0_i32_0 : i32, i32, i32
  }
}

</mosaic_0001>

<bundles_post_ra>
// kernel: basic_block_forward.5
= control target key start
LH: loop header
LB: loop body
LE: loop exit
PB: predicated region body
PF: predicated region fallthrough
CT: control target
= control target key end

     0   :  { %s759_s24 = smov 0   ;;  %s870_s0 = inlined_call_operand.vmem [shape: bf16[2,80,128], index: 0, kind: input, shape index: {}]   ;;  %s871_s1 = inlined_call_operand.vmem [shape: f32[1,128], index: 1, kind: input, shape index: {}]   ;;  %s872_s2 = inlined_call_operand.vmem [shape: f32[1,128], index: 2, kind: input, shape index: {}]   ;;  %s873_s3 = inlined_call_operand.vmem [shape: bf16[2,80,4], index: 3, kind: input, shape index: {}]   ;;  %s874_s4 = inlined_call_operand.vmem [shape: bf16[4,128], index: 4, kind: input, shape index: {}]   ;;  %s875_s5 = inlined_call_operand.vmem [shape: f32[1,128], index: 5, kind: input, shape index: {}]   ;;  %s876_s6 = inlined_call_operand.vmem [shape: f32[1,128], index: 6, kind: input, shape index: {}]   ;;  %s877_s7 = inlined_call_operand.vmem [shape: f32[2,80,128], index: 7, kind: output, shape index: {}]  }
   0x1 LB: > { %s614_s25 = sadd.s32 4294967295, %s715_s24   ;;  %p618_p0 = scmp.ge.s32.totalorder %s715_s24, 1  ;;  %s715_s24 = sphi %s759_s24, %s17_s24  }
   0x2   : > { %p247_p1 = scmp.lt.s32.totalorder %s715_s24, 3 }
   0x4   : > { %p248_p2 = pnand %p618_p0, %p247_p1 }
   0x5   : > { %v364_v0 = vld [vmem:[%s874_s4] sm:$0x3] (!%p248_p2)  ;;  %vm406_vm0 = vcmask (!%p248_p2), 1041408   ;;  %p284_p3 = scmp.lt.s32.totalorder (!%p248_p2), %s614_s25, 1  ;;  %v717_v1 = vmov (!%p248_p2), 0.0   ;;  %vm718_vm1 = vmmov (!%p248_p2), 0  }
   0x6   : > { %251 = sbr.rel (%p248_p2) target bundleno = 257 (0x101), region = 48  ;;  %668 = vmatprep.subr.bf16.mxu0 (!%p248_p2), %v717_v1  ;;  %v408_v2 = vsel (!%p248_p2), %vm406_vm0, %v364_v0, 0  ;;  %670 = vmatprep.mubr.msk.bf16.mxu0 (!%p248_p2), %vm718_vm1, %v717_v1  ;;  %vm390_vm2 = vcmask (!%p248_p2), 31744   ;;  %v791_v11 = vld [vmem:[%s871_s1] ss:$0 sm:$0xff] (!%p248_p2) }
   0x7   : > { %669 = vmatpush3.bf16.msra.mxu0 (!%p248_p2), %v408_v2  ;;  %690 = vmatprep.subr.bf16.mxu1 (!%p248_p2), %v717_v1  ;;  %v797_v16 = vld [vmem:[%s872_s2] ss:$0 sm:$0xff] (!%p248_p2) }
   0x8   : > { %691 = vmatpush3.bf16.msra.mxu1 (!%p248_p2), %v408_v2  ;;  %682 = vmatprep.mubr.msk.bf16.mxu1 (!%p248_p2), %vm718_vm1, %v717_v1  ;;  %v806_v21 = vld [vmem:[%s875_s5] ss:$0 sm:$0xff] (!%p248_p2) }
   0x9   : > { %v817_v33 = vld [vmem:[%s876_s6] ss:$0 sm:$0xff] (!%p248_p2) }
   0xd   : > { %s879_s25 = smov (!%p284_p3, %s614_s25), 1 }
   0xe   : > { %s692_s28 = smul.u32 40, %s879_s25 }
   0xf   : > { %s693_s18 = smul.u32 80, %s879_s25 }
  0x10   : > { %s293_s8 = scalar_lea.vmem %s873_s3, %s692_s28  ;;  %s784_s11 = scalar_lea.vmem %s870_s0, %s692_s28 }
  0x11   : > { %v704_v3 = vld [vmem:[%s293_s8] sm:$0xff]   ;;  %v705_v4 = vld [vmem:[%s293_s8 + $0x18] sm:$0xff]   ;;  %v706_v5 = vld [vmem:[%s293_s8 + $0x8] sm:$0xff]   ;;  %s831_s23 = scalar_lea.vmem %s877_s7, %s693_s18 }
  0x12   : > { %671 = vmatmul.mubr.msk.bf16.vlgmr.msra.gmra.mrb[0].mxu0 %vm390_vm2, %v704_v3  ;;  %683 = vmatmul.mubr.msk.bf16.vlgmr.msra.gmra.mrb[0].mxu1 %vm390_vm2, %v705_v4  ;;  %v707_v6 = vld [vmem:[%s293_s8 + $0x20] sm:$0xff]   ;;  %v708_v7 = vld [vmem:[%s293_s8 + $0x10] sm:$0xff]   ;;  %v660_v9 = vld [vmem:[%s784_s11 + $0x18] sm:$0xff]  }
  0x13   : > { %674 = vmatprep.mubr.msk.bf16.mxu0 %vm718_vm1, %v717_v1  ;;  %686 = vmatprep.mubr.msk.bf16.mxu1 %vm718_vm1, %v717_v1  ;;  %v639_v8 = vld [vmem:[%s784_s11] sm:$0xff]   ;;  %v652_v12 = vunpack.c.l.bf16 %v660_v9  ;;  %v653_v14 = vunpack.c.h.bf16 %v660_v9  ;;  %v658_v18 = vld [vmem:[%s784_s11 + $0x8] sm:$0xff]   ;;  %v659_v48 = vld [vmem:[%s784_s11 + $0x10] sm:$0xff]  }
  0x14   : > { %v640_v10 = vunpack.c.l.bf16 %v639_v8  ;;  %v641_v13 = vunpack.c.h.bf16 %v639_v8  ;;  %v661_v20 = vld [vmem:[%s784_s11 + $0x20] sm:$0xff]   ;;  %v644_v24 = vunpack.c.l.bf16 %v658_v18  ;;  %v645_v32 = vunpack.c.h.bf16 %v658_v18 }
  0x15   : > { %v333_v17 = vmul.f32 %v652_v12, %v791_v11  ;;  %v334_v22 = vmul.f32 %v653_v14, %v791_v11  ;;  %v656_v27 = vunpack.c.l.bf16 %v661_v20  ;;  %v657_v38 = vunpack.c.h.bf16 %v661_v20 }
  0x16   : > { %v327_v15 = vmul.f32 %v640_v10, %v791_v11  ;;  %v328_v19 = vmul.f32 %v641_v13, %v791_v11  ;;  %v329_v43 = vmul.f32 %v644_v24, %v791_v11  ;;  %v330_v51 = vmul.f32 %v645_v32, %v791_v11 }
  0x17   : > { %v350_v26 = vadd.f32 %v797_v16, %v333_v17  ;;  %v351_v37 = vadd.f32 %v797_v16, %v334_v22  ;;  %v335_v47 = vmul.f32 %v656_v27, %v791_v11  ;;  %v336_v54 = vmul.f32 %v657_v38, %v791_v11 }
  0x18   : > { %v344_v23 = vadd.f32 %v797_v16, %v327_v15  ;;  %v345_v30 = vadd.f32 %v797_v16, %v328_v19  ;;  %v346_v57 = vadd.f32 %v797_v16, %v329_v43  ;;  %v648_v58 = vunpack.c.l.bf16 %v659_v48 }
  0x19   : > { %v352_v62 = vadd.f32 %v797_v16, %v335_v47  ;;  %v347_v2 = vadd.f32 %v797_v16, %v330_v51  ;;  %v649_v4 = vunpack.c.h.bf16 %v659_v48  ;;  %v353_v9 = vadd.f32 %v797_v16, %v336_v54 }
  0x1a   : > { %675 = vmatmul.mubr.msk.bf16.gmra.mrb[4].mxu0 %vm390_vm2, %v706_v5  ;;  %687 = vmatmul.mubr.msk.bf16.gmra.mrb[4].mxu1 %vm390_vm2, %v707_v6  ;;  %v331_v15 = vmul.f32 %v648_v58, %v791_v11 }
  0x1b   : > { %678 = vmatprep.mubr.msk.bf16.mxu0 %vm718_vm1, %v717_v1 }
  0x22   : > { %679 = vmatmul.mubr.msk.bf16.gmra.mrb[8].mxu0 %vm390_vm2, %v708_v7 }
  0xe5   : > { %v444_v25 = vpop.f32.mrb[0].mxu0  ;;  %v468_v31 = vpop.f32.mrb[0].mxu1 }
  0xe6   : > { %v490_v28 = vmul.f32 %v806_v21, %v444_v25  ;;  %v672_v29 = vpop.f32.mrb[1].mxu0  ;;  %v496_v35 = vmul.f32 %v806_v21, %v468_v31  ;;  %v684_v36 = vpop.f32.mrb[1].mxu1 }
  0xe7   : > { %v447_v34 = vpop.f32.mrb[2].mxu0  ;;  %v471_v42 = vpop.f32.mrb[2].mxu1 }
  0xe8   : > { %v500_v39 = vadd.f32 %v490_v28, %v344_v23  ;;  %v491_v40 = vmul.f32 %v806_v21, %v447_v34  ;;  %v673_v41 = vpop.f32.mrb[3].mxu0  ;;  %v506_v44 = vadd.f32 %v496_v35, %v350_v26  ;;  %v497_v45 = vmul.f32 %v806_v21, %v471_v42  ;;  %v685_v46 = vpop.f32.mrb[3].mxu1 }
  0xe9   : > { %v332_v23 = vmul.f32 %v649_v4, %v791_v11  ;;  %v348_v28 = vadd.f32 %v797_v16, %v331_v15 }
  0xea   : > { %v517_v49 = vadd.f32 %v817_v33, %v500_v39  ;;  %v501_v50 = vadd.f32 %v491_v40, %v345_v30  ;;  %v523_v52 = vadd.f32 %v817_v33, %v506_v44  ;;  %v507_v53 = vadd.f32 %v497_v45, %v351_v37 }
  0xeb   : > { %v349_v35 = vadd.f32 %v797_v16, %v332_v23 }
  0xec   : > { %v527_v55 = vmax.f32 %v517_v49, 0.0  ;;  %v518_v56 = vadd.f32 %v817_v33, %v501_v50  ;;  %v533_v59 = vmax.f32 %v523_v52, 0.0  ;;  %v524_v60 = vadd.f32 %v817_v33, %v507_v53 }
  0xed   : > { %v452_v61 = vpop.f32.mrb[4].mxu0  ;;  %v476_v3 = vpop.f32.mrb[4].mxu1 }
  0xee   : > { %537 = vst [vmem:[%s831_s23] sm:$0xff] %v527_v55  ;;  %v528_v63 = vmax.f32 %v518_v56, 0.0  ;;  %v492_v0 = vmul.f32 %v806_v21, %v452_v61  ;;  %v676_v1 = vpop.f32.mrb[5].mxu0  ;;  %543 = vst [vmem:[%s831_s23 + $0x30] sm:$0xff] %v533_v59  ;;  %v534_v5 = vmax.f32 %v524_v60, 0.0  ;;  %v498_v7 = vmul.f32 %v806_v21, %v476_v3  ;;  %v688_v8 = vpop.f32.mrb[5].mxu1 }
  0xef   : > { %v455_v6 = vpop.f32.mrb[6].mxu0  ;;  %v479_v14 = vpop.f32.mrb[6].mxu1 }
  0xf0   : > { %538 = vst [vmem:[%s831_s23 + $0x8] sm:$0xff] %v528_v63  ;;  %v502_v10 = vadd.f32 %v492_v0, %v346_v57  ;;  %v493_v12 = vmul.f32 %v806_v21, %v455_v6  ;;  %v677_v13 = vpop.f32.mrb[7].mxu0  ;;  %544 = vst [vmem:[%s831_s23 + $0x38] sm:$0xff] %v534_v5  ;;  %v508_v17 = vadd.f32 %v498_v7, %v352_v62  ;;  %v689_v19 = vpop.f32.mrb[7].mxu1 }
  0xf1   : > { %v499_v18 = vmul.f32 %v806_v21, %v479_v14 }
  0xf2   : > { %v519_v20 = vadd.f32 %v817_v33, %v502_v10  ;;  %v503_v22 = vadd.f32 %v493_v12, %v347_v2  ;;  %v525_v24 = vadd.f32 %v817_v33, %v508_v17 }
  0xf3   : > { %v509_v25 = vadd.f32 %v499_v18, %v353_v9 }
  0xf4   : > { %v529_v26 = vmax.f32 %v519_v20, 0.0  ;;  %v520_v27 = vadd.f32 %v817_v33, %v503_v22  ;;  %v535_v29 = vmax.f32 %v525_v24, 0.0 }
  0xf5   : > { %v526_v30 = vadd.f32 %v817_v33, %v509_v25  ;;  %v460_v31 = vpop.f32.mrb[8].mxu0 }
  0xf6   : > { %539 = vst [vmem:[%s831_s23 + $0x10] sm:$0xff] %v529_v26  ;;  %v530_v32 = vmax.f32 %v520_v27, 0.0  ;;  %v494_v34 = vmul.f32 %v806_v21, %v460_v31  ;;  %v680_v11 = vpop.f32.mrb[9].mxu0  ;;  %545 = vst [vmem:[%s831_s23 + $0x40] sm:$0xff] %v535_v29 }
  0xf7   : > { %v536_v36 = vmax.f32 %v526_v30, 0.0  ;;  %v463_v37 = vpop.f32.mrb[10].mxu0 }
  0xf8   : > { %540 = vst [vmem:[%s831_s23 + $0x18] sm:$0xff] %v530_v32  ;;  %v504_v38 = vadd.f32 %v494_v34, %v348_v28  ;;  %v495_v39 = vmul.f32 %v806_v21, %v463_v37  ;;  %v681_v40 = vpop.f32.mrb[11].mxu0 }
  0xf9   : > { %546 = vst [vmem:[%s831_s23 + $0x48] sm:$0xff] %v536_v36 }
  0xfa   : > { %v521_v41 = vadd.f32 %v817_v33, %v504_v38  ;;  %v505_v42 = vadd.f32 %v495_v39, %v349_v35 }
  0xfc   : > { %v531_v43 = vmax.f32 %v521_v41, 0.0  ;;  %v522_v44 = vadd.f32 %v817_v33, %v505_v42 }
  0xfe   : > { %541 = vst [vmem:[%s831_s23 + $0x20] sm:$0xff] %v531_v43  ;;  %v532_v45 = vmax.f32 %v522_v44, 0.0 }
 0x100   : > { %542 = vst [vmem:[%s831_s23 + $0x28] sm:$0xff] %v532_v45 }
 0x101 PF: > { %s17_s24 = sadd.s32 1, %s715_s24  }
 0x102   : > { %p14_p4 = scmp.ge.s32.totalorder %s17_s24, 4  }
 0x104   :  { %16 = sbr.rel (!%p14_p4) target bundleno = 1 (0x1), region = 81 }

// kernel: basic_block_forward.3
= control target key start
LH: loop header
LB: loop body
LE: loop exit
PB: predicated region body
PF: predicated region fallthrough
CT: control target
= control target key end

     0   :  { %s1514_s24 = smov 0   ;;  %s1643_s0 = inlined_call_operand.vmem [shape: bf16[2,80,36], index: 0, kind: input, shape index: {}]   ;;  %s1644_s1 = inlined_call_operand.vmem [shape: bf16[36,128], index: 1, kind: input, shape index: {}]   ;;  %s1645_s2 = inlined_call_operand.vmem [shape: bf16[2,80,4], index: 2, kind: input, shape index: {}]   ;;  %s1646_s3 = inlined_call_operand.vmem [shape: bf16[4,128], index: 3, kind: input, shape index: {}]   ;;  %s1647_s4 = inlined_call_operand.vmem [shape: f32[1,80], index: 4, kind: input, shape index: {}]   ;;  %s1648_s5 = inlined_call_operand.vmem [shape: bf16[2,80,128], index: 5, kind: output, shape index: {0}]   ;;  %s1649_s6 = inlined_call_operand.vmem [shape: f32[2,2,128], index: 6, kind: output, shape index: {1}]   ;;  %s1650_s7 = inlined_call_operand.vmem [shape: f32[2,2,128], index: 7, kind: output, shape index: {2}]  }
   0x1 LB: > { %s1092_s25 = sadd.s32 4294967295, %s1469_s24   ;;  %p1096_p0 = scmp.ge.s32.totalorder %s1469_s24, 1  ;;  %s1469_s24 = sphi %s1514_s24, %s18_s24  }
   0x2   : > { %p252_p1 = scmp.lt.s32.totalorder %s1469_s24, 3 }
   0x4   : > { %p253_p2 = pnand %p1096_p0, %p252_p1 }
   0x5   : > { %v1450_v0 = vld [vmem:[%s1644_s1] sm:$0xff] (!%p253_p2)   ;;  %v1471_v1 = vmov (!%p253_p2), 0.0   ;;  %v1451_v2 = vld [vmem:[%s1644_s1 + $0x8] sm:$0xff] (!%p253_p2)   ;;  %v1452_v3 = vld [vmem:[%s1644_s1 + $0x10] ss:$0 sps:$4 sm:$0x33] (!%p253_p2)  }
   0x6   : > { %256 = sbr.rel (%p253_p2) target bundleno = 780 (0x30c), region = 40  ;;  %1238 = vmatprep.subr.bf16.mxu0 (!%p253_p2), %v1471_v1  ;;  %vm1472_vm0 = vmmov (!%p253_p2), 0   ;;  %p297_p3 = scmp.lt.s32.totalorder (!%p253_p2), %s1092_s25, 1  ;;  %vm392_vm1 = vcmask (!%p253_p2), 1041408   ;;  %vm376_vm2 = vcmask (!%p253_p2), 293888   ;;  %v1473_v10 = vmov (!%p253_p2), 0.0|0.0  }
   0x7   : > { %1239 = vmatpush3.bf16.msra.mxu0 (!%p253_p2), %v1450_v0  ;;  %1244 = vmatprep.mubr.msk.bf16.mxu0 (!%p253_p2), %vm1472_vm0, %v1471_v1  ;;  %v394_v4 = vsel (!%p253_p2), %vm392_vm1, %v1452_v3, 0  ;;  %v1579_v51 = vld [vmem:[%s1647_s4] sm:$0x1] (!%p253_p2)  ;;  %vm520_vm3 = vcmask (!%p253_p2), 654336   ;;  %vm716_vm4 = vcmask (!%p253_p2), 31744   ;;  %vm677_vm5 = vcmask (!%p253_p2), 1040384  }
   0x8   : > { %1240 = vmatprep.subr.bf16.mxu0 (!%p253_p2), %v1471_v1  ;;  %1284 = vmatprep.mubr.msk.f32.mxu1 (!%p253_p2), %vm1472_vm0, %v1471_v1  ;;  %v690_v52 = vld [vmem:[%s1646_s3] sm:$0x3] (!%p253_p2) }
   0x9   : > { %1378 = vmatprep.subr.bf16.mxu1 (!%p253_p2), %v1473_v10  ;;  %v733_v53 = vsel (!%p253_p2), %vm392_vm1, %v690_v52, 0 }
   0xb   : > { %1241 = vmatpush3.bf16.msra.mxu0 (!%p253_p2), %v1451_v2 }
   0xc   : > { %1242 = vmatprep.subr.bf16.mxu0 (!%p253_p2), %v1471_v1 }
   0xd   : > { %s1652_s25 = smov (!%p297_p3, %s1092_s25), 1 }
   0xe   : > { %s1438_s9 = smul.u32 40, %s1652_s25  ;;  %s1100_s23 = sshll.u32 %s1652_s25, 1 }
   0xf   : > { %1243 = vmatpush3.bf16.msra.mxu0 %v394_v4  ;;  %s315_s28 = scalar_lea.vmem %s1649_s6, %s1100_s23  ;;  %s319_s8 = scalar_lea.vmem %s1650_s7, %s1100_s23 }
  0x10   : > { %s301_s12 = scalar_lea.vmem %s1643_s0, %s1438_s9  ;;  %1408 = vmatprep.subr.bf16.mxu0 %v1473_v10  ;;  %s1560_s15 = scalar_lea.vmem %s1645_s2, %s1438_s9 }
  0x11   : > { %v1453_v5 = vld [vmem:[%s301_s12] sm:$0xff]   ;;  %v1454_v6 = vld [vmem:[%s301_s12 + $0x8] sm:$0xff]   ;;  %v1455_v7 = vld [vmem:[%s301_s12 + $0x10] sm:$0xff]   ;;  %s1565_s18 = scalar_lea.vmem %s1648_s5, %s1438_s9 }
  0x12   : > { %1245 = vmatmul.mubr.msk.bf16.vlgmr.msra.gmra.mrb[0].mxu0 %vm376_vm2, %v1453_v5  ;;  %v1456_v8 = vld [vmem:[%s301_s12 + $0x18] sm:$0xff]   ;;  %v1457_v9 = vld [vmem:[%s301_s12 + $0x20] sm:$0xff]   ;;  %v1459_v55 = vld [vmem:[%s1560_s15 + $0x8] sm:$0xff]  }
  0x13   : > { %1248 = vmatprep.mubr.msk.bf16.mxu0 %vm1472_vm0, %v1471_v1  ;;  %v1458_v54 = vld [vmem:[%s1560_s15] sm:$0xff]   ;;  %v1460_v56 = vld [vmem:[%s1560_s15 + $0x10] sm:$0xff]   ;;  %v1461_v57 = vld [vmem:[%s1560_s15 + $0x18] sm:$0xff]  }
  0x14   : > { %v1462_v58 = vld [vmem:[%s1560_s15 + $0x20] sm:$0xff]  }
  0x1a   : > { %1249 = vmatmul.mubr.msk.bf16.gmra.mrb[4].mxu0 %vm376_vm2, %v1454_v6 }
  0x1b   : > { %1252 = vmatprep.mubr.msk.bf16.mxu0 %vm1472_vm0, %v1471_v1 }
  0x22   : > { %1253 = vmatmul.mubr.msk.bf16.gmra.mrb[8].mxu0 %vm376_vm2, %v1455_v7 }
  0x23   : > { %1256 = vmatprep.mubr.msk.bf16.mxu0 %vm1472_vm0, %v1471_v1 }
  0x2a   : > { %1257 = vmatmul.mubr.msk.bf16.gmra.mrb[12].mxu0 %vm376_vm2, %v1456_v8 }
  0x2b   : > { %1260 = vmatprep.mubr.msk.bf16.mxu0 %vm1472_vm0, %v1471_v1 }
  0x32   : > { %1261 = vmatmul.mubr.msk.bf16.gmra.mrb[16].mxu0 %vm376_vm2, %v1457_v9 }
  0x33   : > { %1352 = vmatprep.mubr.msk.f32.mxu0 %vm1472_vm0, %v1471_v1 }
  0xe5   : > { %v430_v11 = vpop.f32.mrb[0].mxu0 }
  0xe6   : > { %v1246_v12 = vpop.f32.mrb[1].mxu0  ;;  %v594_v14 = vmul.f32 %v430_v11, %v430_v11 }
  0xe7   : > { %v433_v13 = vpop.f32.mrb[2].mxu0 }
  0xe8   : > { %v595_v15 = vmul.f32 %v433_v13, %v433_v13  ;;  %v1247_v16 = vpop.f32.mrb[3].mxu0  ;;  %v1154_v17 = vpack.c.bf16 %v433_v13, %v430_v11 }
  0xea   : > { %v1394_v18 = vpack.c.bf16 %v595_v15, %v594_v14  ;;  %1155 = vst [vmem:[%s1565_s18] sm:$0xff] %v1154_v17   ;;  %1380 = vmatpush3.bf16.msra.mxu1 %v1154_v17 }
  0xeb   : > { %1381 = vmatprep.subr.bf16.mxu1 %v1473_v10 }
  0xed   : > { %v438_v19 = vpop.f32.mrb[4].mxu0 }
  0xee   : > { %v1250_v20 = vpop.f32.mrb[5].mxu0  ;;  %v596_v22 = vmul.f32 %v438_v19, %v438_v19 }
  0xef   : > { %v441_v21 = vpop.f32.mrb[6].mxu0 }
  0xf0   : > { %v1159_v23 = vpack.c.bf16 %v441_v21, %v438_v19  ;;  %v597_v24 = vmul.f32 %v441_v21, %v441_v21  ;;  %v1251_v25 = vpop.f32.mrb[7].mxu0 }
  0xf2   : > { %1176 = vst [vmem:[%s1565_s18 + $0x8] sm:$0xff] %v1159_v23   ;;  %v1397_v26 = vpack.c.bf16 %v597_v24, %v596_v22  ;;  %1383 = vmatpush3.bf16.msra.mxu1 %v1159_v23 }
  0xf3   : > { %1384 = vmatprep.subr.bf16.mxu1 %v1473_v10 }
  0xf5   : > { %v446_v27 = vpop.f32.mrb[8].mxu0 }
  0xf6   : > { %v1254_v28 = vpop.f32.mrb[9].mxu0  ;;  %v598_v30 = vmul.f32 %v446_v27, %v446_v27 }
  0xf7   : > { %v449_v29 = vpop.f32.mrb[10].mxu0 }
  0xf8   : > { %v1164_v31 = vpack.c.bf16 %v449_v29, %v446_v27  ;;  %v599_v32 = vmul.f32 %v449_v29, %v449_v29  ;;  %v1255_v33 = vpop.f32.mrb[11].mxu0 }
  0xfa   : > { %1177 = vst [vmem:[%s1565_s18 + $0x10] sm:$0xff] %v1164_v31   ;;  %v1400_v34 = vpack.c.bf16 %v599_v32, %v598_v30  ;;  %1386 = vmatpush3.bf16.msra.mxu1 %v1164_v31 }
  0xfb   : > { %1387 = vmatprep.subr.bf16.mxu1 %v1473_v10 }
  0xfd   : > { %v454_v35 = vpop.f32.mrb[12].mxu0 }
  0xfe   : > { %v1258_v36 = vpop.f32.mrb[13].mxu0  ;;  %v600_v38 = vmul.f32 %v454_v35, %v454_v35 }
  0xff   : > { %v457_v37 = vpop.f32.mrb[14].mxu0 }
 0x100   : > { %v1169_v39 = vpack.c.bf16 %v457_v37, %v454_v35  ;;  %v601_v40 = vmul.f32 %v457_v37, %v457_v37  ;;  %v1259_v41 = vpop.f32.mrb[15].mxu0 }
 0x102   : > { %1178 = vst [vmem:[%s1565_s18 + $0x18] sm:$0xff] %v1169_v39   ;;  %v1403_v42 = vpack.c.bf16 %v601_v40, %v600_v38  ;;  %1389 = vmatpush3.bf16.msra.mxu1 %v1169_v39 }
 0x103   : > { %1390 = vmatprep.subr.bf16.mxu1 %v1473_v10 }
 0x105   : > { %v462_v43 = vpop.f32.mrb[16].mxu0 }
 0x106   : > { %v1262_v44 = vpop.f32.mrb[17].mxu0  ;;  %v602_v46 = vmul.f32 %v462_v43, %v462_v43 }
 0x107   : > { %v465_v45 = vpop.f32.mrb[18].mxu0 }
 0x108   : > { %v1174_v47 = vpack.c.bf16 %v465_v45, %v462_v43  ;;  %v603_v48 = vmul.f32 %v465_v45, %v465_v45  ;;  %v1263_v49 = vpop.f32.mrb[19].mxu0 }
 0x10a   : > { %1179 = vst [vmem:[%s1565_s18 + $0x20] sm:$0xff] %v1174_v47   ;;  %v1406_v50 = vpack.c.bf16 %v603_v48, %v602_v46  ;;  %1392 = vmatpush3.bf16.msra.mxu1 %v1174_v47 }
 0x10b   : > { %1393 = vmatprep.subr.bf16.mxu1 %v1473_v10 }
 0x10d   : > { %1285 = vmatmul.mubr.msk.f32.vlgmr.msra.gmra.mrb[0].mxu1 %vm520_vm3, %v1579_v51 }
 0x10e   : > { %1395 = vmatpush3.bf16.msra.mxu1 %v1394_v18  ;;  %1307 = vmatprep.mubr.msk.f32.mxu1 %vm1472_vm0, %v1471_v1 }
 0x10f   : > { %1396 = vmatprep.subr.bf16.mxu1 %v1473_v10 }
 0x112   : > { %1398 = vmatpush3.bf16.msra.mxu1 %v1397_v26 }
 0x113   : > { %1399 = vmatprep.subr.bf16.mxu1 %v1473_v10 }
 0x116   : > { %1401 = vmatpush3.bf16.msra.mxu1 %v1400_v34 }
 0x117   : > { %1402 = vmatprep.subr.bf16.mxu1 %v1473_v10 }
 0x11a   : > { %1404 = vmatpush3.bf16.msra.mxu1 %v1403_v42 }
 0x11b   : > { %1405 = vmatprep.subr.bf16.mxu1 %v1473_v10 }
 0x11e   : > { %1407 = vmatpush3.bf16.msra.mxu1 %v1406_v50 }
 0x11f   : > { %1310 = vmatprep.subr.bf16.mxu1 %v1471_v1 }
 0x121   : > { %1308 = vmatmul.mubr.msk.f32.vlgmr.msra.gmra.mrb[2].mxu1 %vm520_vm3, %v1579_v51 }
 0x122   : > { %1311 = vmatpush3.bf16.msra.mxu1 %v733_v53  ;;  %1312 = vmatprep.mubr.msk.bf16.mxu1 %vm1472_vm0, %v1471_v1 }
 0x125   : > { %1313 = vmatmul.mubr.msk.bf16.vlgmr.msra.gmra.mrb[4].mxu1 %vm716_vm4, %v1458_v54 }
 0x126   : > { %1316 = vmatprep.mubr.msk.bf16.mxu1 %vm1472_vm0, %v1471_v1 }
 0x12d   : > { %1317 = vmatmul.mubr.msk.bf16.gmra.mrb[8].mxu1 %vm716_vm4, %v1459_v55 }
 0x12e   : > { %1320 = vmatprep.mubr.msk.bf16.mxu1 %vm1472_vm0, %v1471_v1 }
 0x135   : > { %1321 = vmatmul.mubr.msk.bf16.gmra.mrb[12].mxu1 %vm716_vm4, %v1460_v56 }
 0x136   : > { %1324 = vmatprep.mubr.msk.bf16.mxu1 %vm1472_vm0, %v1471_v1 }
 0x13d   : > { %1325 = vmatmul.mubr.msk.bf16.gmra.mrb[16].mxu1 %vm716_vm4, %v1461_v57 }
 0x13e   : > { %1328 = vmatprep.mubr.msk.bf16.mxu1 %vm1472_vm0, %v1471_v1 }
 0x145   : > { %1329 = vmatmul.mubr.msk.bf16.gmra.mrb[20].mxu1 %vm716_vm4, %v1462_v58 }
 0x1e0   : > { %v590_v59 = vpop.f32.mrb[0].mxu1 }
 0x1e1   : > { %v1286_v60 = vpop.f32.mrb[1].mxu1 }
 0x1f4   : > { %v670_v61 = vpop.f32.mrb[2].mxu1 }
 0x1f5   : > { %v675_v62 = vrot.slane %v670_v61, 7  ;;  %v1309_v63 = vpop.f32.mrb[3].mxu1 }
 0x1f7   : > { %v678_v0 = vsel %vm677_vm5, %v590_v59, %v675_v62 }
 0x1f8   : > { %679 = vst [vmem:[%s315_s28] sm:$0x3] %v678_v0  ;;  %v769_v2 = vpop.f32.mrb[4].mxu1 }
 0x1f9   : > { %v1314_v3 = vpop.f32.mrb[5].mxu1  ;;  %v878_v5 = vmul.f32 %v769_v2, %v769_v2 }
 0x1fa   : > { %v772_v4 = vpop.f32.mrb[6].mxu1 }
 0x1fb   : > { %v1409_v6 = vpack.c.bf16 %v772_v4, %v769_v2  ;;  %v879_v7 = vmul.f32 %v772_v4, %v772_v4  ;;  %v1315_v8 = vpop.f32.mrb[7].mxu1 }
 0x1fd   : > { %v1424_v9 = vpack.c.bf16 %v879_v7, %v878_v5  ;;  %1410 = vmatpush3.bf16.msra.mxu0 %v1409_v6 }
 0x1fe   : > { %1411 = vmatprep.subr.bf16.mxu0 %v1473_v10 }
 0x200   : > { %v777_v11 = vpop.f32.mrb[8].mxu1 }
 0x201   : > { %v1318_v12 = vpop.f32.mrb[9].mxu1  ;;  %v880_v14 = vmul.f32 %v777_v11, %v777_v11 }
 0x202   : > { %v780_v13 = vpop.f32.mrb[10].mxu1 }
 0x203   : > { %v1412_v15 = vpack.c.bf16 %v780_v13, %v777_v11  ;;  %v881_v16 = vmul.f32 %v780_v13, %v780_v13  ;;  %v1319_v17 = vpop.f32.mrb[11].mxu1 }
 0x205   : > { %v1427_v18 = vpack.c.bf16 %v881_v16, %v880_v14  ;;  %1413 = vmatpush3.bf16.msra.mxu0 %v1412_v15 }
 0x206   : > { %1414 = vmatprep.subr.bf16.mxu0 %v1473_v10 }
 0x208   : > { %v785_v19 = vpop.f32.mrb[12].mxu1 }
 0x209   : > { %v1322_v20 = vpop.f32.mrb[13].mxu1  ;;  %v882_v22 = vmul.f32 %v785_v19, %v785_v19 }
 0x20a   : > { %v788_v21 = vpop.f32.mrb[14].mxu1 }
 0x20b   : > { %v1415_v23 = vpack.c.bf16 %v788_v21, %v785_v19  ;;  %v883_v24 = vmul.f32 %v788_v21, %v788_v21  ;;  %v1323_v25 = vpop.f32.mrb[15].mxu1 }
 0x20d   : > { %v1430_v26 = vpack.c.bf16 %v883_v24, %v882_v22  ;;  %1416 = vmatpush3.bf16.msra.mxu0 %v1415_v23 }
 0x20e   : > { %1417 = vmatprep.subr.bf16.mxu0 %v1473_v10 }
 0x210   : > { %v793_v27 = vpop.f32.mrb[16].mxu1 }
 0x211   : > { %v1326_v28 = vpop.f32.mrb[17].mxu1  ;;  %v884_v30 = vmul.f32 %v793_v27, %v793_v27 }
 0x212   : > { %v796_v29 = vpop.f32.mrb[18].mxu1 }
 0x213   : > { %v1418_v31 = vpack.c.bf16 %v796_v29, %v793_v27  ;;  %v885_v32 = vmul.f32 %v796_v29, %v796_v29  ;;  %v1327_v33 = vpop.f32.mrb[19].mxu1 }
 0x215   : > { %v1433_v34 = vpack.c.bf16 %v885_v32, %v884_v30  ;;  %1419 = vmatpush3.bf16.msra.mxu0 %v1418_v31 }
 0x216   : > { %1420 = vmatprep.subr.bf16.mxu0 %v1473_v10 }
 0x218   : > { %v801_v35 = vpop.f32.mrb[20].mxu1 }
 0x219   : > { %v1330_v36 = vpop.f32.mrb[21].mxu1  ;;  %v886_v38 = vmul.f32 %v801_v35, %v801_v35 }
 0x21a   : > { %v804_v37 = vpop.f32.mrb[22].mxu1 }
 0x21b   : > { %v1421_v39 = vpack.c.bf16 %v804_v37, %v801_v35  ;;  %v887_v40 = vmul.f32 %v804_v37, %v804_v37  ;;  %v1331_v41 = vpop.f32.mrb[23].mxu1 }
 0x21d   : > { %v1436_v42 = vpack.c.bf16 %v887_v40, %v886_v38  ;;  %1422 = vmatpush3.bf16.msra.mxu0 %v1421_v39 }
 0x21e   : > { %1423 = vmatprep.subr.bf16.mxu0 %v1473_v10 }
 0x220   : > { %1353 = vmatmul.mubr.msk.f32.vlgmr.msra.gmra.mrb[20].mxu0 %vm520_vm3, %v1579_v51 }
 0x221   : > { %1425 = vmatpush3.bf16.msra.mxu0 %v1424_v9  ;;  %1375 = vmatprep.mubr.msk.f32.mxu0 %vm1472_vm0, %v1471_v1 }
 0x222   : > { %1426 = vmatprep.subr.bf16.mxu0 %v1473_v10 }
 0x225   : > { %1428 = vmatpush3.bf16.msra.mxu0 %v1427_v18 }
 0x226   : > { %1429 = vmatprep.subr.bf16.mxu0 %v1473_v10 }
 0x229   : > { %1431 = vmatpush3.bf16.msra.mxu0 %v1430_v26 }
 0x22a   : > { %1432 = vmatprep.subr.bf16.mxu0 %v1473_v10 }
 0x22d   : > { %1434 = vmatpush3.bf16.msra.mxu0 %v1433_v34 }
 0x22e   : > { %1435 = vmatprep.subr.bf16.mxu0 %v1473_v10 }
 0x231   : > { %1437 = vmatpush3.bf16.msra.mxu0 %v1436_v42 }
 0x234   : > { %1376 = vmatmul.mubr.msk.f32.vlgmr.msra.gmra.mrb[22].mxu0 %vm520_vm3, %v1579_v51 }
 0x2f3   : > { %v874_v43 = vpop.f32.mrb[20].mxu0 }
 0x2f4   : > { %v1354_v44 = vpop.f32.mrb[21].mxu0 }
 0x307   : > { %v954_v45 = vpop.f32.mrb[22].mxu0 }
 0x308   : > { %v959_v1 = vrot.slane %v954_v45, 7  ;;  %v1377_v46 = vpop.f32.mrb[23].mxu0 }
 0x30a   : > { %v961_v47 = vsel %vm677_vm5, %v874_v43, %v959_v1 }
 0x30b   : > { %962 = vst [vmem:[%s319_s8] sm:$0x3] %v961_v47 }
 0x30c PF: > { %s18_s24 = sadd.s32 1, %s1469_s24  }
 0x30d   : > { %p15_p4 = scmp.ge.s32.totalorder %s18_s24, 4  }
 0x30f   :  { %17 = sbr.rel (!%p15_p4) target bundleno = 1 (0x1), region = 97 }

// kernel: basic_block_forward.4
= control target key start
LH: loop header
LB: loop body
LE: loop exit
PB: predicated region body
PF: predicated region fallthrough
CT: control target
= control target key end

     0   :  { %s3488_s24 = smov 0   ;;  %s4094_s0 = inlined_call_operand.vmem [shape: bf16[2,80,128], index: 0, kind: input, shape index: {}]   ;;  %s4095_s1 = inlined_call_operand.vmem [shape: f32[1,128], index: 1, kind: input, shape index: {}]   ;;  %s4096_s2 = inlined_call_operand.vmem [shape: f32[1,128], index: 2, kind: input, shape index: {}]   ;;  %s4097_s3 = inlined_call_operand.vmem [shape: f32[80,1], index: 3, kind: input, shape index: {}]   ;;  %s4098_s4 = inlined_call_operand.vmem [shape: f32[1,80], index: 4, kind: input, shape index: {}]   ;;  %s4099_s5 = inlined_call_operand.vmem [shape: f32[9,128,128], index: 5, kind: input, shape index: {}]   ;;  %s4100_s6 = inlined_call_operand.vmem [shape: bf16[2,80,128], index: 6, kind: output, shape index: {0}]   ;;  %s4101_s7 = inlined_call_operand.vmem [shape: f32[2,2,128], index: 7, kind: output, shape index: {1}]  }
   0x1 LB: > { %s2082_s25 = sadd.s32 4294967295, %s3442_s24   ;;  %p2086_p0 = scmp.ge.s32.totalorder %s3442_s24, 1  ;;  %s3442_s24 = sphi %s3488_s24, %s18_s24  }
   0x2   : > { %p240_p1 = scmp.lt.s32.totalorder %s3442_s24, 3 }
   0x4   : > { %p241_p2 = pnand %p2086_p0, %p240_p1 }
   0x5   : > { %v356_v0 = vld [vmem:[%s4097_s3 + $0x10] sm:$0xff] (!%p241_p2)  ;;  %v354_v1 = vld [vmem:[%s4097_s3] sm:$0xff] (!%p241_p2)  ;;  %v3444_v2 = vmov (!%p241_p2), 0   ;;  %v357_v3 = vld [vmem:[%s4097_s3 + $0x18] sm:$0xff] (!%p241_p2)  ;;  %v3445_v7 = vmov (!%p241_p2), 0.0   ;;  %p276_p3 = scmp.lt.s32.totalorder (!%p241_p2), %s2082_s25, 1 }
   0x6   : > { %244 = sbr.rel (%p241_p2) target bundleno = 743 (0x2e7), region = 44  ;;  %3434 = vset.pattern.permute.xlu1 (!%p241_p2), %v3444_v2  ;;  %3433 = vset.pattern.permute.xlu0 (!%p241_p2), %v3444_v2  ;;  %v355_v4 = vld [vmem:[%s4097_s3 + $0x8] sm:$0xff] (!%p241_p2)  ;;  %v2092_v5 = vld [vmem:[%s4099_s5 + $0x80] sm:$0xff] (!%p241_p2)  ;;  %424 = vst [vmem:[#allocation2] sm:$0xff] (!%p241_p2), %v3445_v7  ;;  %425 = vst [vmem:[#allocation2 + $0x8] sm:$0xff] (!%p241_p2), %v3445_v7  ;;  %vm3447_vm0 = vmmov (!%p241_p2), 0  }
   0x7   : > { %376 = vperm.xlu1 (!%p241_p2), %3434, %v356_v0   ;;  %366 = vperm.xlu0 (!%p241_p2), %3433, %v354_v1   ;;  %v2093_v6 = vld [vmem:[%s4099_s5 + $0x88] sm:$0xff] (!%p241_p2)  ;;  %436 = vst [vmem:[#allocation2 + $0x60] sm:$0xff] (!%p241_p2), %v3445_v7  ;;  %437 = vst [vmem:[#allocation2 + $0x68] sm:$0xff] (!%p241_p2), %v3445_v7  ;;  %v2094_v9 = vld [vmem:[%s4099_s5 + $0x90] sm:$0xff] (!%p241_p2)  ;;  %vm1836_vm1 = vcmask (!%p241_p2), 654336   ;;  %vm1993_vm2 = vcmask (!%p241_p2), 1040384  }
   0x8   : > { %v3022_v8 = vpack.c.bf16 (!%p241_p2), %v2093_v6, %v2092_v5  ;;  %v2095_v10 = vld [vmem:[%s4099_s5 + $0x98] sm:$0xff] (!%p241_p2)  ;;  %v2140_v11 = vld [vmem:[%s4099_s5 + $0x200] sm:$0xff] (!%p241_p2)  ;;  %v2141_v13 = vld [vmem:[%s4099_s5 + $0x208] sm:$0xff] (!%p241_p2) }
   0x9   : > { %v3026_v12 = vpack.c.bf16 (!%p241_p2), %v2095_v10, %v2094_v9  ;;  %v2096_v14 = vld [vmem:[%s4099_s5 + $0xa0] sm:$0xff] (!%p241_p2)  ;;  %v3150_v15 = vpack.c.bf16 (!%p241_p2), %v2141_v13, %v2140_v11  ;;  %v2097_v16 = vld [vmem:[%s4099_s5 + $0xa8] sm:$0xff] (!%p241_p2)  ;;  %v2142_v17 = vld [vmem:[%s4099_s5 + $0x210] sm:$0xff] (!%p241_p2) }
   0xa   : > { %v2143_v18 = vld [vmem:[%s4099_s5 + $0x218] sm:$0xff] (!%p241_p2)  ;;  %v359_v19 = vld [vmem:[%s4097_s3 + $0x28] sm:$0xff] (!%p241_p2)  ;;  %v358_v20 = vld [vmem:[%s4097_s3 + $0x20] sm:$0xff] (!%p241_p2)  ;;  %3023 = vmatprep.subr.bf16.mxu1 (!%p241_p2), %v3022_v8  ;;  %v3030_v24 = vpack.c.bf16 (!%p241_p2), %v2097_v16, %v2096_v14 }
   0xb   : > { %381 = vperm.xlu1 (!%p241_p2), %3434, %v357_v3   ;;  %371 = vperm.xlu0 (!%p241_p2), %3433, %v355_v4   ;;  %v3154_v21 = vpack.c.bf16 (!%p241_p2), %v2143_v18, %v2142_v17  ;;  %v2144_v22 = vld [vmem:[%s4099_s5 + $0x220] sm:$0xff] (!%p241_p2)  ;;  %v2145_v23 = vld [vmem:[%s4099_s5 + $0x228] sm:$0xff] (!%p241_p2)  ;;  %v2098_v25 = vld [vmem:[%s4099_s5 + $0xb0] sm:$0xff] (!%p241_p2) }
   0xc   : > { %3025 = vmatpush3.bf16.msra.mxu1 (!%p241_p2), %v3022_v8  ;;  %3151 = vmatprep.subr.bf16.mxu0 (!%p241_p2), %v3150_v15  ;;  %v2099_v26 = vld [vmem:[%s4099_s5 + $0xb8] sm:$0xff] (!%p241_p2)  ;;  %v360_v28 = vld [vmem:[%s4097_s3 + $0x30] sm:$0xff] (!%p241_p2)  ;;  %v3158_v29 = vpack.c.bf16 (!%p241_p2), %v2145_v23, %v2144_v22  ;;  %v363_v32 = vld [vmem:[%s4097_s3 + $0x48] sm:$0xff] (!%p241_p2) }
   0xd   : > { %3027 = vmatprep.subr.bf16.mxu1 %v3026_v12  ;;  %3153 = vmatpush3.bf16.msra.mxu0 %v3150_v15  ;;  %v361_v27 = vld [vmem:[%s4097_s3 + $0x38] sm:$0xff]  ;;  %v2146_v30 = vld [vmem:[%s4099_s5 + $0x230] sm:$0xff]  ;;  %v3034_v33 = vpack.c.bf16 %v2099_v26, %v2098_v25  ;;  %v362_v34 = vld [vmem:[%s4097_s3 + $0x40] sm:$0xff]  ;;  %s4103_s25 = smov (!%p276_p3, %s2082_s25), 1 }
   0xe   : > { %3155 = vmatprep.subr.bf16.mxu0 %v3154_v21  ;;  %v2147_v31 = vld [vmem:[%s4099_s5 + $0x238] sm:$0xff]  ;;  %v2100_v35 = vld [vmem:[%s4099_s5 + $0xc0] sm:$0xff]  ;;  %v2101_v36 = vld [vmem:[%s4099_s5 + $0xc8] sm:$0xff]  ;;  %s3420_s11 = smul.u32 40, %s4103_s25  ;;  %s2089_s19 = sshll.u32 %s4103_s25, 1 }
   0xf   : > { %391 = vperm.xlu1 %3434, %v359_v19   ;;  %386 = vperm.xlu0 %3433, %v358_v20   ;;  %v3162_v37 = vpack.c.bf16 %v2147_v31, %v2146_v30  ;;  %v2148_v38 = vld [vmem:[%s4099_s5 + $0x240] sm:$0xff]  ;;  %v2149_v39 = vld [vmem:[%s4099_s5 + $0x248] sm:$0xff]  ;;  %v3038_v41 = vpack.c.bf16 %v2101_v36, %v2100_v35  ;;  %v2102_v42 = vld [vmem:[%s4099_s5 + $0xd0] sm:$0xff]  ;;  %s289_s22 = scalar_lea.vmem %s4101_s7, %s2089_s19 }
  0x10   : > { %3029 = vmatpush3.bf16.msra.mxu1 %v3026_v12  ;;  %v464_v40 = vld [vmem:[#allocation2 + $0x6] sm:$0xff]  ;;  %v2103_v43 = vld [vmem:[%s4099_s5 + $0xd8] sm:$0xff]  ;;  %v3166_v44 = vpack.c.bf16 %v2149_v39, %v2148_v38  ;;  %v2150_v45 = vld [vmem:[%s4099_s5 + $0x250] sm:$0xff]  ;;  %s280_s14 = scalar_lea.vmem %s4094_s0, %s3420_s11  ;;  %s4066_s17 = scalar_lea.vmem %s4100_s6, %s3420_s11 }
  0x11   : > { %3031 = vmatprep.subr.bf16.mxu1 %v3030_v24  ;;  %3157 = vmatpush3.bf16.msra.mxu0 %v3154_v21  ;;  %v2151_v46 = vld [vmem:[%s4099_s5 + $0x258] sm:$0xff]  ;;  %v3042_v47 = vpack.c.bf16 %v2103_v43, %v2102_v42  ;;  %v2104_v48 = vld [vmem:[%s4099_s5 + $0xe0] sm:$0xff]  ;;  %v2105_v49 = vld [vmem:[%s4099_s5 + $0xe8] sm:$0xff] }
  0x12   : > { %3159 = vmatprep.subr.bf16.mxu0 %v3158_v29  ;;  %2585 = vmatprep.mubr.f32.mxu1 %v464_v40  ;;  %v3170_v50 = vpack.c.bf16 %v2151_v46, %v2150_v45  ;;  %v2152_v51 = vld [vmem:[%s4099_s5 + $0x260] sm:$0xff]  ;;  %v2153_v52 = vld [vmem:[%s4099_s5 + $0x268] sm:$0xff]  ;;  %v3046_v53 = vpack.c.bf16 %v2105_v49, %v2104_v48  ;;  %v2106_v54 = vld [vmem:[%s4099_s5 + $0xf0] sm:$0xff] }
  0x13   : > { %401 = vperm.xlu1 %3434, %v361_v27   ;;  %396 = vperm.xlu0 %3433, %v360_v28   ;;  %v2107_v55 = vld [vmem:[%s4099_s5 + $0xf8] sm:$0xff]  ;;  %v3174_v56 = vpack.c.bf16 %v2153_v52, %v2152_v51  ;;  %v2154_v57 = vld [vmem:[%s4099_s5 + $0x270] sm:$0xff]  ;;  %v448_v60 = vld [vmem:[%s4099_s5] sm:$0xff] }
  0x14   : > { %3033 = vmatpush3.bf16.msra.mxu1 %v3030_v24  ;;  %v2155_v58 = vld [vmem:[%s4099_s5 + $0x278] sm:$0xff]  ;;  %v3050_v59 = vpack.c.bf16 %v2107_v55, %v2106_v54  ;;  %v449_v61 = vld [vmem:[%s4099_s5 + $0x8] sm:$0xff]  ;;  %v2156_v63 = vld [vmem:[%s4099_s5 + $0x280] sm:$0xff] }
  0x15   : > { %3035 = vmatprep.subr.bf16.mxu1 %v3034_v33  ;;  %3161 = vmatpush3.bf16.msra.mxu0 %v3158_v29  ;;  %v3178_v62 = vpack.c.bf16 %v2155_v58, %v2154_v57  ;;  %v2157_v0 = vld [vmem:[%s4099_s5 + $0x288] sm:$0xff]  ;;  %v3634_v1 = vpack.c.bf16 %v449_v61, %v448_v60  ;;  %v2245_v4 = vld [vmem:[%s280_s14] sm:$0xff]   ;;  %v2290_v9 = vld [vmem:[%s280_s14 + $0x10] sm:$0xff]  }
  0x16   : > { %3163 = vmatprep.subr.bf16.mxu0 %v3162_v37  ;;  %v3636_v2 = vpack.c.bf16 %v2157_v0, %v2156_v63  ;;  %v2289_v3 = vld [vmem:[%s280_s14 + $0x8] sm:$0xff]   ;;  %v2246_v6 = vunpack.c.l.bf16 %v2245_v4  ;;  %v2090_v7 = vld [vmem:[%s4095_s1] ss:$0 sm:$0xff]  ;;  %v2247_v12 = vunpack.c.h.bf16 %v2245_v4  ;;  %v2255_v15 = vunpack.c.h.bf16 %v2290_v9  ;;  %v2291_v20 = vld [vmem:[%s280_s14 + $0x18] sm:$0xff]  }
  0x17   : > { %411 = vperm.xlu1 %3434, %v363_v32   ;;  %406 = vperm.xlu0 %3433, %v362_v34   ;;  %v2250_v5 = vunpack.c.l.bf16 %v2289_v3  ;;  %v2251_v8 = vunpack.c.h.bf16 %v2289_v3  ;;  %v2091_v13 = vld [vmem:[%s4096_s2] ss:$0 sm:$0xff]  ;;  %v2254_v16 = vunpack.c.l.bf16 %v2290_v9  ;;  %v2259_v24 = vunpack.c.h.bf16 %v2291_v20  ;;  %v2158_v42 = vld [vmem:[%s4099_s5 + $0x290] sm:$0xff]  ;;  %v2159_v43 = vld [vmem:[%s4099_s5 + $0x298] sm:$0xff] }
  0x18   : > { %3037 = vmatpush3.bf16.msra.mxu1 %v3034_v33  ;;  %v317_v11 = vmul.f32 %v2246_v6, %v2090_v7  ;;  %v318_v19 = vmul.f32 %v2247_v12, %v2090_v7  ;;  %v322_v22 = vmul.f32 %v2255_v15, %v2090_v7  ;;  %v2258_v28 = vunpack.c.l.bf16 %v2291_v20  ;;  %v2292_v29 = vld [vmem:[%s280_s14 + $0x20] sm:$0xff]   ;;  %v450_v54 = vld [vmem:[%s4099_s5 + $0x10] sm:$0xff]  ;;  %v451_v55 = vld [vmem:[%s4099_s5 + $0x18] sm:$0xff] }
  0x19   : > { %3039 = vmatprep.subr.bf16.mxu1 %v3038_v41  ;;  %3165 = vmatpush3.bf16.msra.mxu0 %v3162_v37  ;;  %v319_v10 = vmul.f32 %v2250_v5, %v2090_v7  ;;  %v320_v14 = vmul.f32 %v2251_v8, %v2090_v7  ;;  %v321_v23 = vmul.f32 %v2254_v16, %v2090_v7  ;;  %v2263_v36 = vunpack.c.h.bf16 %v2292_v29  ;;  %v2160_v57 = vld [vmem:[%s4099_s5 + $0x2a0] sm:$0xff]  ;;  %v2161_v58 = vld [vmem:[%s4099_s5 + $0x2a8] sm:$0xff]  ;;  %v2162_v12 = vld [vmem:[%s4099_s5 + $0x2b0] sm:$0xff] }
  0x1a   : > { %3167 = vmatprep.subr.bf16.mxu0 %v3166_v44  ;;  %v334_v18 = vadd.f32 %v2091_v13, %v317_v11  ;;  %v335_v27 = vadd.f32 %v2091_v13, %v318_v19  ;;  %v339_v31 = vadd.f32 %v2091_v13, %v322_v22  ;;  %v324_v35 = vmul.f32 %v2259_v24, %v2090_v7  ;;  %v452_v6 = vld [vmem:[%s4099_s5 + $0x20] sm:$0xff]  ;;  %v455_v20 = vld [vmem:[%s4099_s5 + $0x38] sm:$0xff] }
  0x1b   : > { %v336_v17 = vadd.f32 %v2091_v13, %v319_v10  ;;  %v337_v21 = vadd.f32 %v2091_v13, %v320_v14  ;;  %v338_v34 = vadd.f32 %v2091_v13, %v321_v23  ;;  %v2262_v37 = vunpack.c.l.bf16 %v2292_v29 }
  0x1c   : > { %3041 = vmatpush3.bf16.msra.mxu1 %v3038_v41  ;;  %v344_v26 = vmax.f32 %v334_v18, 0.0  ;;  %v345_v40 = vmax.f32 %v335_v27, 0.0  ;;  %v323_v41 = vmul.f32 %v2258_v28, %v2090_v7  ;;  %v341_v48 = vadd.f32 %v2091_v13, %v324_v35  ;;  %v2167_v35 = vld [vmem:[%s4099_s5 + $0x2d8] sm:$0xff] }
  0x1d   : > { %3043 = vmatprep.subr.bf16.mxu1 %v3042_v47  ;;  %3169 = vmatpush3.bf16.msra.mxu0 %v3166_v44  ;;  %v346_v25 = vmax.f32 %v336_v17, 0.0  ;;  %v347_v30 = vmax.f32 %v337_v21, 0.0  ;;  %v349_v44 = vmax.f32 %v339_v31, 0.0  ;;  %v326_v49 = vmul.f32 %v2263_v36, %v2090_v7  ;;  %v456_v31 = vld [vmem:[%s4099_s5 + $0x40] sm:$0xff] }
  0x1e   : > { %3171 = vmatprep.subr.bf16.mxu0 %v3170_v50  ;;  %v3058_v61 = vpack.c.bf16 %v451_v55, %v450_v54  ;;  %v351_v4 = vmax.f32 %v341_v48, 0.0  ;;  %v3190_v9 = vpack.c.bf16 %v2161_v58, %v2160_v57  ;;  %v461_v48 = vld [vmem:[%s4099_s5 + $0x68] sm:$0xff]  ;;  %v462_v55 = vld [vmem:[%s4099_s5 + $0x70] sm:$0xff]  ;;  %v463_v57 = vld [vmem:[%s4099_s5 + $0x78] sm:$0xff] }
  0x1f   : > { %v2172_v58 = vld [vmem:[%s4099_s5 + $0x300] sm:$0xff] }
  0x20   : > { %3045 = vmatpush3.bf16.msra.mxu1 %v3042_v47  ;;  %v348_v47 = vmax.f32 %v338_v34, 0.0  ;;  %v2166_v34 = vld [vmem:[%s4099_s5 + $0x2d0] sm:$0xff] }
  0x21   : > { %3047 = vmatprep.subr.bf16.mxu1 %v3046_v53  ;;  %3173 = vmatpush3.bf16.msra.mxu0 %v3170_v50  ;;  %v325_v50 = vmul.f32 %v2262_v37, %v2090_v7  ;;  %v453_v7 = vld [vmem:[%s4099_s5 + $0x28] sm:$0xff] }
  0x22   : > { %3175 = vmatprep.subr.bf16.mxu0 %v3174_v56  ;;  %v3062_v11 = vpack.c.bf16 %v453_v7, %v452_v6  ;;  %v2111_v6 = vld [vmem:[%s4099_s5 + $0x118] sm:$0xff] }
  0x23   : > { %v342_v63 = vadd.f32 %v2091_v13, %v325_v50 }
  0x24   : > { %3049 = vmatpush3.bf16.msra.mxu1 %v3046_v53  ;;  %v340_v53 = vadd.f32 %v2091_v13, %v323_v41  ;;  %v3202_v41 = vpack.c.bf16 %v2167_v35, %v2166_v34 }
  0x25   : > { %3051 = vmatprep.subr.bf16.mxu1 %v3050_v59  ;;  %3177 = vmatpush3.bf16.msra.mxu0 %v3174_v56  ;;  %v3186_v56 = vpack.c.bf16 %v2159_v43, %v2158_v42  ;;  %v352_v17 = vmax.f32 %v342_v63, 0.0  ;;  %v2168_v42 = vld [vmem:[%s4099_s5 + $0x2e0] sm:$0xff]  ;;  %v2169_v43 = vld [vmem:[%s4099_s5 + $0x2e8] sm:$0xff] }
  0x26   : > { %3179 = vmatprep.subr.bf16.mxu0 %v3178_v62  ;;  %v350_v5 = vmax.f32 %v340_v53, 0.0  ;;  %v3206_v50 = vpack.c.bf16 %v2169_v43, %v2168_v42  ;;  %v438_v53 = vld [vmem:[#allocation2 + $0x5] sm:$0xff]  ;;  %v2119_v43 = vld [vmem:[%s4099_s5 + $0x158] sm:$0xff] }
  0x27   : > { %v2109_v63 = vld [vmem:[%s4099_s5 + $0x108] sm:$0xff] }
  0x28   : > { %3053 = vmatpush3.bf16.msra.mxu1 %v3050_v59 }
  0x29   : > { %3055 = vmatprep.subr.bf16.mxu1 %v3634_v1  ;;  %3181 = vmatpush3.bf16.msra.mxu0 %v3178_v62  ;;  %v343_v62 = vadd.f32 %v2091_v13, %v326_v49  ;;  %v2163_v13 = vld [vmem:[%s4099_s5 + $0x2b8] sm:$0xff] }
  0x2a   : > { %3183 = vmatprep.subr.bf16.mxu0 %v3636_v2  ;;  %v3194_v22 = vpack.c.bf16 %v2163_v13, %v2162_v12  ;;  %v2177_v12 = vld [vmem:[%s4099_s5 + $0x328] sm:$0xff] }
  0x2b   : > { %v353_v16 = vmax.f32 %v343_v62, 0.0  ;;  %v2108_v62 = vld [vmem:[%s4099_s5 + $0x100] sm:$0xff] }
  0x86   : > { %v377_v32 = vpop.permute.xlu1 %376  ;;  %v367_v33 = vpop.permute.xlu0 %366 }
  0x87   : > { %v416_v38 = vmul.f32 %v377_v32, %v346_v25  ;;  %v414_v39 = vmul.f32 %v367_v33, %v344_v26  ;;  %v2164_v25 = vld [vmem:[%s4099_s5 + $0x2c0] sm:$0xff]  ;;  %v2165_v26 = vld [vmem:[%s4099_s5 + $0x2c8] sm:$0xff] }
  0x88   : > { %v457_v32 = vld [vmem:[%s4099_s5 + $0x48] sm:$0xff]  ;;  %v3198_v33 = vpack.c.bf16 %v2165_v26, %v2164_v25  ;;  %v2180_v26 = vld [vmem:[%s4099_s5 + $0x340] sm:$0xff] }
  0x89   : > { %428 = vst [vmem:[#allocation2 + $0x20] sm:$0xff] %v416_v38  ;;  %426 = vst [vmem:[#allocation2 + $0x10] sm:$0xff] %v414_v39  ;;  %2773 = vmatprep.mubr.f32.mxu0 %v414_v39  ;;  %v3070_v37 = vpack.c.bf16 %v457_v32, %v456_v31  ;;  %v458_v39 = vld [vmem:[%s4099_s5 + $0x50] sm:$0xff]  ;;  %v2181_v31 = vld [vmem:[%s4099_s5 + $0x348] sm:$0xff] }
  0x8a   : > { %v382_v45 = vpop.permute.xlu1 %381  ;;  %v372_v46 = vpop.permute.xlu0 %371 }
  0x8b   : > { %v417_v51 = vmul.f32 %v382_v45, %v347_v30  ;;  %v415_v52 = vmul.f32 %v372_v46, %v345_v40  ;;  %v459_v40 = vld [vmem:[%s4099_s5 + $0x58] sm:$0xff] }
  0x8c   : > { %v3074_v46 = vpack.c.bf16 %v459_v40, %v458_v39  ;;  %v2118_v40 = vld [vmem:[%s4099_s5 + $0x150] sm:$0xff] }
  0x8d   : > { %429 = vst [vmem:[#allocation2 + $0x28] sm:$0xff] %v417_v51  ;;  %427 = vst [vmem:[#allocation2 + $0x18] sm:$0xff] %v415_v52  ;;  %2774 = vmatmul.mubr.f32.vlgmr.msra.gmra.mrb[0].mxu0 %v415_v52  ;;  %v2171_v52 = vld [vmem:[%s4099_s5 + $0x2f8] sm:$0xff] }
  0x8e   : > { %v392_v59 = vpop.permute.xlu1 %391  ;;  %v387_v60 = vpop.permute.xlu0 %386  ;;  %3185 = vmatpush3.bf16.msra.mxu0 %v3636_v2  ;;  %2776 = vmatprep.mubr.f32.mxu0 %v416_v38 }
  0x8f   : > { %v419_v0 = vmul.f32 %v392_v59, %v349_v44  ;;  %v418_v3 = vmul.f32 %v387_v60, %v348_v47  ;;  %3187 = vmatprep.subr.bf16.mxu0 %v3186_v56  ;;  %v460_v44 = vld [vmem:[%s4099_s5 + $0x60] sm:$0xff]  ;;  %v2173_v59 = vld [vmem:[%s4099_s5 + $0x308] sm:$0xff]  ;;  %v3082_v60 = vpack.c.bf16 %v463_v57, %v462_v55  ;;  %v2186_v55 = vld [vmem:[%s4099_s5 + $0x370] sm:$0xff] }
  0x90   : > { %v465_v8 = vld [vmem:[#allocation2 + $0xe] sm:$0xff]  ;;  %v3078_v54 = vpack.c.bf16 %v461_v48, %v460_v44 }
  0x91   : > { %431 = vst [vmem:[#allocation2 + $0x38] sm:$0xff] %v419_v0  ;;  %430 = vst [vmem:[#allocation2 + $0x30] sm:$0xff] %v418_v3  ;;  %2586 = vmatmul.mubr.f32.vlgmr.msra.gmra.mrb[0].mxu1 %v465_v8  ;;  %2777 = vmatmul.mubr.f32.gmra.mrb[2].mxu0 %v417_v51  ;;  %v2170_v51 = vld [vmem:[%s4099_s5 + $0x2f0] sm:$0xff]  ;;  %v2185_v48 = vld [vmem:[%s4099_s5 + $0x368] sm:$0xff] }
  0x92   : > { %3057 = vmatpush3.bf16.msra.mxu1 %v3634_v1  ;;  %v402_v2 = vpop.permute.xlu1 %401  ;;  %v397_v10 = vpop.permute.xlu0 %396  ;;  %3189 = vmatpush3.bf16.msra.mxu0 %v3186_v56  ;;  %v454_v1 = vld [vmem:[%s4099_s5 + $0x30] sm:$0xff]  ;;  %v3210_v56 = vpack.c.bf16 %v2171_v52, %v2170_v51  ;;  %v2120_v52 = vld [vmem:[%s4099_s5 + $0x160] sm:$0xff] }
  0x93   : > { %v421_v14 = vmul.f32 %v402_v2, %v351_v4  ;;  %v420_v15 = vmul.f32 %v397_v10, %v350_v5  ;;  %3059 = vmatprep.subr.bf16.mxu1 %v3058_v61  ;;  %2779 = vmatprep.mubr.f32.mxu0 %v418_v3  ;;  %v3066_v29 = vpack.c.bf16 %v455_v20, %v454_v1  ;;  %v2175_v3 = vld [vmem:[%s4099_s5 + $0x318] sm:$0xff]  ;;  %v2110_v5 = vld [vmem:[%s4099_s5 + $0x110] sm:$0xff]  ;;  %v2112_v10 = vld [vmem:[%s4099_s5 + $0x120] sm:$0xff] }
  0x94   : > { %v466_v18 = vld [vmem:[#allocation2 + $0x16] sm:$0xff]  ;;  %v467_v19 = vld [vmem:[#allocation2 + $0x1e] sm:$0xff]  ;;  %3191 = vmatprep.subr.bf16.mxu0 %v3190_v9  ;;  %v468_v21 = vld [vmem:[#allocation2 + $0x26] sm:$0xff]  ;;  %v3086_v4 = vpack.c.bf16 %v2109_v63, %v2108_v62  ;;  %v3090_v2 = vpack.c.bf16 %v2111_v6, %v2110_v5 }
  0x95   : > { %433 = vst [vmem:[#allocation2 + $0x48] sm:$0xff] %v421_v14  ;;  %432 = vst [vmem:[#allocation2 + $0x40] sm:$0xff] %v420_v15  ;;  %2588 = vmatprep.mubr.f32.mxu1 %v466_v18  ;;  %2780 = vmatmul.mubr.f32.gmra.mrb[4].mxu0 %v419_v0  ;;  %v1177_v47 = vld [vmem:[#allocation2 + $0x11] sm:$0xff]  ;;  %v3768_v7 = vld [vmem:[#allocation2 + $0x19] sm:$0xff] }
  0x96   : > { %3061 = vmatpush3.bf16.msra.mxu1 %v3058_v61  ;;  %v412_v23 = vpop.permute.xlu1 %411  ;;  %v407_v24 = vpop.permute.xlu0 %406  ;;  %3193 = vmatpush3.bf16.msra.mxu0 %v3190_v9  ;;  %v3214_v61 = vpack.c.bf16 %v2173_v59, %v2172_v58  ;;  %v2174_v0 = vld [vmem:[%s4099_s5 + $0x310] sm:$0xff]  ;;  %v3771_v9 = vld [vmem:[#allocation2 + $0x21] sm:$0xff]  ;;  %v2123_v59 = vld [vmem:[%s4099_s5 + $0x178] sm:$0xff] }
  0x97   : > { %v423_v27 = vmul.f32 %v412_v23, %v353_v16  ;;  %v422_v28 = vmul.f32 %v407_v24, %v352_v17  ;;  %2589 = vmatmul.mubr.f32.gmra.mrb[2].mxu1 %v467_v19  ;;  %3063 = vmatprep.subr.bf16.mxu1 %v3062_v11  ;;  %v3218_v8 = vpack.c.bf16 %v2175_v3, %v2174_v0  ;;  %v439_v13 = vld [vmem:[#allocation2 + $0xd] sm:$0xff]  ;;  %v440_v16 = vld [vmem:[#allocation2 + $0x15] sm:$0xff]  ;;  %v442_v25 = vld [vmem:[#allocation2 + $0x25] sm:$0xff] }
  0x98   : > { %2591 = vmatprep.mubr.f32.mxu1 %v468_v21  ;;  %v469_v30 = vld [vmem:[#allocation2 + $0x2e] sm:$0xff]  ;;  %2782 = vmatprep.mubr.f32.mxu0 %v420_v15  ;;  %v470_v36 = vld [vmem:[#allocation2 + $0x36] sm:$0xff]  ;;  %v2124_v0 = vld [vmem:[%s4099_s5 + $0x180] sm:$0xff] }
  0x99   : > { %435 = vst [vmem:[#allocation2 + $0x58] sm:$0xff] %v423_v27  ;;  %434 = vst [vmem:[#allocation2 + $0x50] sm:$0xff] %v422_v28  ;;  %3195 = vmatprep.subr.bf16.mxu0 %v3194_v22  ;;  %2783 = vmatmul.mubr.f32.gmra.mrb[6].mxu0 %v421_v14  ;;  %v2113_v14 = vld [vmem:[%s4099_s5 + $0x128] sm:$0xff]  ;;  %v3789_v17 = vld [vmem:[#allocation2 + $0x31] sm:$0xff] }
  0x9a   : > { %3065 = vmatpush3.bf16.msra.mxu1 %v3062_v11  ;;  %3197 = vmatpush3.bf16.msra.mxu0 %v3194_v22  ;;  %v2176_v11 = vld [vmem:[%s4099_s5 + $0x320] sm:$0xff]  ;;  %v3786_v15 = vld [vmem:[#allocation2 + $0x29] sm:$0xff]  ;;  %v3094_v1 = vpack.c.bf16 %v2113_v14, %v2112_v10  ;;  %v2179_v21 = vld [vmem:[%s4099_s5 + $0x338] sm:$0xff] }
  0x9b   : > { %2592 = vmatmul.mubr.f32.gmra.mrb[4].mxu1 %v469_v30  ;;  %3067 = vmatprep.subr.bf16.mxu1 %v3066_v29  ;;  %v2114_v18 = vld [vmem:[%s4099_s5 + $0x130] sm:$0xff]  ;;  %v3222_v19 = vpack.c.bf16 %v2177_v12, %v2176_v11  ;;  %v441_v22 = vld [vmem:[#allocation2 + $0x1d] sm:$0xff]  ;;  %v2189_v62 = vld [vmem:[%s4099_s5 + $0x388] sm:$0xff] }
  0x9c   : > { %2594 = vmatprep.mubr.f32.mxu1 %v470_v36  ;;  %v471_v38 = vld [vmem:[#allocation2 + $0x3e] sm:$0xff]  ;;  %2785 = vmatprep.mubr.f32.mxu0 %v422_v28  ;;  %v472_v45 = vld [vmem:[#allocation2 + $0x46] sm:$0xff]  ;;  %v2178_v20 = vld [vmem:[%s4099_s5 + $0x330] sm:$0xff] }
  0x9d   : > { %3199 = vmatprep.subr.bf16.mxu0 %v3198_v33  ;;  %2786 = vmatmul.mubr.f32.gmra.mrb[8].mxu0 %v423_v27  ;;  %v2115_v23 = vld [vmem:[%s4099_s5 + $0x138] sm:$0xff]  ;;  %v3810_v28 = vld [vmem:[#allocation2 + $0x41] sm:$0xff]  ;;  %v3226_v30 = vpack.c.bf16 %v2179_v21, %v2178_v20  ;;  %v443_v32 = vld [vmem:[#allocation2 + $0x2d] sm:$0xff] }
  0x9e   : > { %3069 = vmatpush3.bf16.msra.mxu1 %v3066_v29  ;;  %3201 = vmatpush3.bf16.msra.mxu0 %v3198_v33  ;;  %v3804_v24 = vld [vmem:[#allocation2 + $0x39] sm:$0xff]  ;;  %v3098_v27 = vpack.c.bf16 %v2115_v23, %v2114_v18  ;;  %v2117_v33 = vld [vmem:[%s4099_s5 + $0x148] sm:$0xff]  ;;  %v2182_v36 = vld [vmem:[%s4099_s5 + $0x350] sm:$0xff] }
  0x9f   : > { %2595 = vmatmul.mubr.f32.gmra.mrb[6].mxu1 %v471_v38  ;;  %3071 = vmatprep.subr.bf16.mxu1 %v3070_v37  ;;  %v2116_v29 = vld [vmem:[%s4099_s5 + $0x140] sm:$0xff]  ;;  %v444_v35 = vld [vmem:[#allocation2 + $0x35] sm:$0xff]  ;;  %v2125_v3 = vld [vmem:[%s4099_s5 + $0x188] sm:$0xff] }
  0xa0   : > { %2597 = vmatprep.mubr.f32.mxu1 %v472_v45  ;;  %v473_v49 = vld [vmem:[#allocation2 + $0x4e] sm:$0xff]  ;;  %2820 = vmatprep.mubr.f32.mxu0 %v1177_v47  ;;  %v3102_v38 = vpack.c.bf16 %v2117_v33, %v2116_v29  ;;  %v445_v42 = vld [vmem:[#allocation2 + $0x3d] sm:$0xff]  ;;  %v446_v45 = vld [vmem:[#allocation2 + $0x45] sm:$0xff] }
  0xa1   : > { %3203 = vmatprep.subr.bf16.mxu0 %v3202_v41  ;;  %v3822_v34 = vld [vmem:[#allocation2 + $0x49] sm:$0xff]  ;;  %v3831_v39 = vld [vmem:[#allocation2 + $0x51] sm:$0xff]  ;;  %v3840_v44 = vld [vmem:[#allocation2 + $0x59] sm:$0xff] }
  0xa2   : > { %3073 = vmatpush3.bf16.msra.mxu1 %v3070_v37  ;;  %3205 = vmatpush3.bf16.msra.mxu0 %v3202_v41  ;;  %v2183_v37 = vld [vmem:[%s4099_s5 + $0x358] sm:$0xff]  ;;  %v3230_v41 = vpack.c.bf16 %v2181_v31, %v2180_v26  ;;  %v2184_v47 = vld [vmem:[%s4099_s5 + $0x360] sm:$0xff]  ;;  %v447_v51 = vld [vmem:[#allocation2 + $0x4d] sm:$0xff] }
  0xa3   : > { %2598 = vmatmul.mubr.f32.gmra.mrb[8].mxu1 %v473_v49  ;;  %3075 = vmatprep.subr.bf16.mxu1 %v3074_v46  ;;  %v3106_v49 = vpack.c.bf16 %v2119_v43, %v2118_v40  ;;  %v2122_v58 = vld [vmem:[%s4099_s5 + $0x170] sm:$0xff]  ;;  %v2191_v6 = vld [vmem:[%s4099_s5 + $0x398] sm:$0xff]  ;;  %v2192_v11 = vld [vmem:[%s4099_s5 + $0x3a0] sm:$0xff] }
  0xa4   : > { %3207 = vmatprep.subr.bf16.mxu0 %v3206_v50  ;;  %2632 = vmatprep.mubr.f32.mxu1 %v438_v53  ;;  %v2121_v53 = vld [vmem:[%s4099_s5 + $0x168] sm:$0xff]  ;;  %v3114_v63 = vpack.c.bf16 %v2123_v59, %v2122_v58  ;;  %v2190_v5 = vld [vmem:[%s4099_s5 + $0x390] sm:$0xff]  ;;  %v3919_v21 = vld [vmem:[#allocation2 + $0x1f] sm:$0xff] }
  0xa5   : > { %v3110_v57 = vpack.c.bf16 %v2121_v53, %v2120_v52  ;;  %v3250_v10 = vpack.c.bf16 %v2191_v6, %v2190_v5  ;;  %v2193_v12 = vld [vmem:[%s4099_s5 + $0x3a8] sm:$0xff]  ;;  %v3909_v18 = vld [vmem:[#allocation2 + $0x17] sm:$0xff] }
  0xa6   : > { %3077 = vmatpush3.bf16.msra.mxu1 %v3074_v46  ;;  %3209 = vmatpush3.bf16.msra.mxu0 %v3206_v50  ;;  %v3234_v46 = vpack.c.bf16 %v2183_v37, %v2182_v36  ;;  %v721_v50 = vld [vmem:[#allocation2 + $0x7] sm:$0xff]  ;;  %v3899_v14 = vld [vmem:[#allocation2 + $0xf] sm:$0xff]  ;;  %v2131_v23 = vld [vmem:[%s4099_s5 + $0x1b8] sm:$0xff] }
  0xa7   : > { %3079 = vmatprep.subr.bf16.mxu1 %v3078_v54  ;;  %3211 = vmatprep.subr.bf16.mxu0 %v3210_v56  ;;  %v3939_v29 = vld [vmem:[#allocation2 + $0x2f] sm:$0xff]  ;;  %v1338_v36 = vld [vmem:[#allocation2 + $0x61] sm:$0xff]  ;;  %v2135_v40 = vld [vmem:[%s4099_s5 + $0x1d8] sm:$0xff] }
  0xa8   : > { %v2133_v31 = vld [vmem:[%s4099_s5 + $0x1c8] sm:$0xff]  ;;  %v3959_v37 = vld [vmem:[#allocation2 + $0x3f] sm:$0xff]  ;;  %v2138_v53 = vld [vmem:[%s4099_s5 + $0x1f0] sm:$0xff] }
  0xa9   : > { %v2201_v43 = vld [vmem:[%s4099_s5 + $0x3e8] sm:$0xff]  ;;  %v1484_v6 = vld [vmem:[#allocation2 + $0x32] sm:$0xff] }
  0xaa   : > { %3081 = vmatpush3.bf16.msra.mxu1 %v3078_v54  ;;  %3213 = vmatpush3.bf16.msra.mxu0 %v3210_v56  ;;  %v3238_v54 = vpack.c.bf16 %v2185_v48, %v2184_v47  ;;  %v2187_v56 = vld [vmem:[%s4099_s5 + $0x378] sm:$0xff]  ;;  %v2136_v47 = vld [vmem:[%s4099_s5 + $0x1e0] sm:$0xff]  ;;  %v2137_v48 = vld [vmem:[%s4099_s5 + $0x1e8] sm:$0xff] }
  0xab   : > { %3083 = vmatprep.subr.bf16.mxu1 %v3082_v60  ;;  %3215 = vmatprep.subr.bf16.mxu0 %v3214_v61  ;;  %v3142_v52 = vpack.c.bf16 %v2137_v48, %v2136_v47 }
  0xad   : > { %2821 = vmatmul.mubr.f32.vlgmr.msra.gmra.mrb[0].mxu0 %v3768_v7 }
  0xae   : > { %3085 = vmatpush3.bf16.msra.mxu1 %v3082_v60  ;;  %2823 = vmatprep.mubr.f32.mxu0 %v3771_v9  ;;  %v3242_v60 = vpack.c.bf16 %v2187_v56, %v2186_v55  ;;  %v2204_v56 = vld [vmem:[%s4099_s5 + $0x400] sm:$0xff] }
  0xaf   : > { %3087 = vmatprep.subr.bf16.mxu1 %v3086_v4  ;;  %3217 = vmatpush3.bf16.msra.mxu0 %v3214_v61  ;;  %v2188_v61 = vld [vmem:[%s4099_s5 + $0x380] sm:$0xff] }
  0xb0   : > { %3219 = vmatprep.subr.bf16.mxu0 %v3218_v8 }
  0xb1   : > { %2633 = vmatmul.mubr.f32.vlgmr.msra.gmra.mrb[0].mxu1 %v439_v13  ;;  %2824 = vmatmul.mubr.f32.gmra.mrb[2].mxu0 %v3786_v15 }
  0xb2   : > { %2635 = vmatprep.mubr.f32.mxu1 %v440_v16  ;;  %3089 = vmatpush3.bf16.msra.mxu1 %v3086_v4  ;;  %v3246_v4 = vpack.c.bf16 %v2189_v62, %v2188_v61  ;;  %v2128_v16 = vld [vmem:[%s4099_s5 + $0x1a0] sm:$0xff]  ;;  %v2207_v61 = vld [vmem:[%s4099_s5 + $0x418] sm:$0xff] }
  0xb3   : > { %3091 = vmatprep.subr.bf16.mxu1 %v3090_v2  ;;  %2826 = vmatprep.mubr.f32.mxu0 %v3789_v17 }
  0xb4   : > { %3221 = vmatpush3.bf16.msra.mxu0 %v3218_v8  ;;  %v2126_v8 = vld [vmem:[%s4099_s5 + $0x190] sm:$0xff] }
  0xb5   : > { %2636 = vmatmul.mubr.f32.gmra.mrb[2].mxu1 %v441_v22  ;;  %2827 = vmatmul.mubr.f32.gmra.mrb[4].mxu0 %v3804_v24  ;;  %v2130_v22 = vld [vmem:[%s4099_s5 + $0x1b0] sm:$0xff] }
  0xb6   : > { %2638 = vmatprep.mubr.f32.mxu1 %v442_v25  ;;  %3093 = vmatpush3.bf16.msra.mxu1 %v3090_v2  ;;  %v2127_v2 = vld [vmem:[%s4099_s5 + $0x198] sm:$0xff]  ;;  %v3929_v25 = vld [vmem:[#allocation2 + $0x27] sm:$0xff] }
  0xb7   : > { %3095 = vmatprep.subr.bf16.mxu1 %v3094_v1  ;;  %3223 = vmatprep.subr.bf16.mxu0 %v3222_v19  ;;  %v3122_v13 = vpack.c.bf16 %v2127_v2, %v2126_v8  ;;  %v2211_v8 = vld [vmem:[%s4099_s5 + $0x438] sm:$0xff] }
  0xb8   : > { %2829 = vmatprep.mubr.f32.mxu0 %v3810_v28  ;;  %3225 = vmatpush3.bf16.msra.mxu0 %v3222_v19  ;;  %v3254_v19 = vpack.c.bf16 %v2193_v12, %v2192_v11  ;;  %v1485_v2 = vld [vmem:[#allocation2 + $0x3a] sm:$0xff]  ;;  %v1486_v11 = vld [vmem:[#allocation2 + $0x42] sm:$0xff] }
  0xb9   : > { %2639 = vmatmul.mubr.f32.gmra.mrb[4].mxu1 %v443_v32  ;;  %2830 = vmatmul.mubr.f32.gmra.mrb[6].mxu0 %v3822_v34  ;;  %v3949_v32 = vld [vmem:[#allocation2 + $0x37] sm:$0xff]  ;;  %v2212_v12 = vld [vmem:[%s4099_s5 + $0x440] sm:$0xff] }
  0xba   : > { %2641 = vmatprep.mubr.f32.mxu1 %v444_v35  ;;  %3097 = vmatpush3.bf16.msra.mxu1 %v3094_v1  ;;  %v2129_v1 = vld [vmem:[%s4099_s5 + $0x1a8] sm:$0xff] }
  0xbb   : > { %3099 = vmatprep.subr.bf16.mxu1 %v3098_v27  ;;  %3227 = vmatprep.subr.bf16.mxu0 %v3226_v30  ;;  %v3126_v20 = vpack.c.bf16 %v2129_v1, %v2128_v16  ;;  %v1488_v1 = vld [vmem:[#allocation2 + $0x52] sm:$0xff] }
  0xbc   : > { %2832 = vmatprep.mubr.f32.mxu0 %v3831_v39  ;;  %3229 = vmatpush3.bf16.msra.mxu0 %v3226_v30  ;;  %v2132_v30 = vld [vmem:[%s4099_s5 + $0x1c0] sm:$0xff] }
  0xbd   : > { %2642 = vmatmul.mubr.f32.gmra.mrb[6].mxu1 %v445_v42  ;;  %2833 = vmatmul.mubr.f32.gmra.mrb[8].mxu0 %v3840_v44  ;;  %v3134_v35 = vpack.c.bf16 %v2133_v31, %v2132_v30  ;;  %v2200_v42 = vld [vmem:[%s4099_s5 + $0x3e0] sm:$0xff]  ;;  %v1635_v30 = vld [vmem:[#allocation2 + $0x2b] sm:$0xff]  ;;  %v1636_v31 = vld [vmem:[#allocation2 + $0x33] sm:$0xff] }
  0xbe   : > { %2644 = vmatprep.mubr.f32.mxu1 %v446_v45  ;;  %3101 = vmatpush3.bf16.msra.mxu1 %v3098_v27  ;;  %v3130_v27 = vpack.c.bf16 %v2131_v23, %v2130_v22  ;;  %v1481_v45 = vld [vmem:[#allocation2 + $0x1a] sm:$0xff]  ;;  %v2217_v22 = vld [vmem:[%s4099_s5 + $0x468] sm:$0xff] }
  0xbf   : > { %3103 = vmatprep.subr.bf16.mxu1 %v3102_v38  ;;  %3231 = vmatprep.subr.bf16.mxu0 %v3230_v41  ;;  %v1633_v23 = vld [vmem:[#allocation2 + $0x1b] sm:$0xff] }
  0xc0   : > { %3233 = vmatpush3.bf16.msra.mxu0 %v3230_v41  ;;  %2867 = vmatprep.mubr.f32.mxu0 %v3768_v7  ;;  %v3118_v7 = vpack.c.bf16 %v2125_v3, %v2124_v0  ;;  %v3969_v41 = vld [vmem:[#allocation2 + $0x47] sm:$0xff] }
  0xc1   : > { %2645 = vmatmul.mubr.f32.gmra.mrb[8].mxu1 %v447_v51  ;;  %3235 = vmatprep.subr.bf16.mxu0 %v3234_v46  ;;  %v2203_v51 = vld [vmem:[%s4099_s5 + $0x3f8] sm:$0xff]  ;;  %v2208_v0 = vld [vmem:[%s4099_s5 + $0x420] sm:$0xff]  ;;  %v2209_v3 = vld [vmem:[%s4099_s5 + $0x428] sm:$0xff] }
  0xc2   : > { %3105 = vmatpush3.bf16.msra.mxu1 %v3102_v38  ;;  %2679 = vmatprep.mubr.f32.mxu1 %v721_v50  ;;  %v2134_v38 = vld [vmem:[%s4099_s5 + $0x1d0] sm:$0xff]  ;;  %v3286_v5 = vpack.c.bf16 %v2209_v3, %v2208_v0 }
  0xc3   : > { %3107 = vmatprep.subr.bf16.mxu1 %v3106_v49  ;;  %v2202_v50 = vld [vmem:[%s4099_s5 + $0x3f0] sm:$0xff] }
  0xc4   : > { %3237 = vmatpush3.bf16.msra.mxu0 %v3234_v46  ;;  %v3978_v46 = vld [vmem:[#allocation2 + $0x4f] sm:$0xff]  ;;  %v3274_v55 = vpack.c.bf16 %v2203_v51, %v2202_v50 }
  0xc5   : > { %3239 = vmatprep.subr.bf16.mxu0 %v3238_v54 }
  0xc6   : > { %3109 = vmatpush3.bf16.msra.mxu1 %v3106_v49  ;;  %v3270_v49 = vpack.c.bf16 %v2201_v43, %v2200_v42 }
  0xc7   : > { %3111 = vmatprep.subr.bf16.mxu1 %v3110_v57 }
  0xc8   : > { %3241 = vmatpush3.bf16.msra.mxu0 %v3238_v54  ;;  %v2139_v54 = vld [vmem:[%s4099_s5 + $0x1f8] sm:$0xff] }
  0xc9   : > { %3243 = vmatprep.subr.bf16.mxu0 %v3242_v60  ;;  %v3146_v58 = vpack.c.bf16 %v2139_v54, %v2138_v53 }
  0xca   : > { %3113 = vmatpush3.bf16.msra.mxu1 %v3110_v57  ;;  %v2205_v57 = vld [vmem:[%s4099_s5 + $0x408] sm:$0xff] }
  0xcb   : > { %3115 = vmatprep.subr.bf16.mxu1 %v3114_v63  ;;  %v3278_v59 = vpack.c.bf16 %v2205_v57, %v2204_v56 }
  0xcc   : > { %3245 = vmatpush3.bf16.msra.mxu0 %v3242_v60  ;;  %v2206_v60 = vld [vmem:[%s4099_s5 + $0x410] sm:$0xff] }
  0xcd   : > { %3247 = vmatprep.subr.bf16.mxu0 %v3246_v4  ;;  %v3282_v62 = vpack.c.bf16 %v2207_v61, %v2206_v60 }
  0xce   : > { %3117 = vmatpush3.bf16.msra.mxu1 %v3114_v63  ;;  %v1482_v63 = vld [vmem:[#allocation2 + $0x22] sm:$0xff] }
  0xcf   : > { %3119 = vmatprep.subr.bf16.mxu1 %v3118_v7  ;;  %2868 = vmatmul.mubr.f32.vlgmr.msra.gmra.mrb[0].mxu0 %v3771_v9  ;;  %v2194_v9 = vld [vmem:[%s4099_s5 + $0x3b0] sm:$0xff] }
  0xd0   : > { %2870 = vmatprep.mubr.f32.mxu0 %v3786_v15  ;;  %3249 = vmatpush3.bf16.msra.mxu0 %v3246_v4  ;;  %v2195_v15 = vld [vmem:[%s4099_s5 + $0x3b8] sm:$0xff]  ;;  %v1483_v4 = vld [vmem:[#allocation2 + $0x2a] sm:$0xff] }
  0xd1   : > { %2680 = vmatmul.mubr.f32.vlgmr.msra.gmra.mrb[0].mxu1 %v3899_v14  ;;  %3251 = vmatprep.subr.bf16.mxu0 %v3250_v10  ;;  %v3258_v26 = vpack.c.bf16 %v2195_v15, %v2194_v9  ;;  %v1489_v9 = vld [vmem:[#allocation2 + $0x5a] sm:$0xff]  ;;  %v1490_v15 = vld [vmem:[#allocation2 + $0x62] sm:$0xff] }
  0xd2   : > { %2682 = vmatprep.mubr.f32.mxu1 %v3909_v18  ;;  %3121 = vmatpush3.bf16.msra.mxu1 %v3118_v7  ;;  %v2210_v7 = vld [vmem:[%s4099_s5 + $0x430] sm:$0xff] }
  0xd3   : > { %3123 = vmatprep.subr.bf16.mxu1 %v3122_v13  ;;  %2871 = vmatmul.mubr.f32.gmra.mrb[2].mxu0 %v3789_v17  ;;  %v2196_v17 = vld [vmem:[%s4099_s5 + $0x3c0] sm:$0xff] }
  0xd4   : > { %2873 = vmatprep.mubr.f32.mxu0 %v3804_v24  ;;  %3253 = vmatpush3.bf16.msra.mxu0 %v3250_v10  ;;  %v2197_v24 = vld [vmem:[%s4099_s5 + $0x3c8] sm:$0xff]  ;;  %v3290_v10 = vpack.c.bf16 %v2211_v8, %v2210_v7 }
  0xd5   : > { %2683 = vmatmul.mubr.f32.gmra.mrb[2].mxu1 %v3919_v21  ;;  %3255 = vmatprep.subr.bf16.mxu0 %v3254_v19  ;;  %v3262_v33 = vpack.c.bf16 %v2197_v24, %v2196_v17  ;;  %v2218_v17 = vld [vmem:[%s4099_s5 + $0x470] sm:$0xff]  ;;  %v2219_v24 = vld [vmem:[%s4099_s5 + $0x478] sm:$0xff] }
  0xd6   : > { %2685 = vmatprep.mubr.f32.mxu1 %v3929_v25  ;;  %3125 = vmatpush3.bf16.msra.mxu1 %v3122_v13  ;;  %v2213_v13 = vld [vmem:[%s4099_s5 + $0x448] sm:$0xff] }
  0xd7   : > { %3127 = vmatprep.subr.bf16.mxu1 %v3126_v20  ;;  %2874 = vmatmul.mubr.f32.gmra.mrb[4].mxu0 %v3810_v28  ;;  %v2198_v28 = vld [vmem:[%s4099_s5 + $0x3d0] sm:$0xff]  ;;  %v3294_v16 = vpack.c.bf16 %v2213_v13, %v2212_v12 }
  0xd8   : > { %2876 = vmatprep.mubr.f32.mxu0 %v3822_v34  ;;  %3257 = vmatpush3.bf16.msra.mxu0 %v3254_v19  ;;  %v2199_v34 = vld [vmem:[%s4099_s5 + $0x3d8] sm:$0xff] }
  0xd9   : > { %2686 = vmatmul.mubr.f32.gmra.mrb[4].mxu1 %v3939_v29  ;;  %3259 = vmatprep.subr.bf16.mxu0 %v3258_v26  ;;  %v2215_v19 = vld [vmem:[%s4099_s5 + $0x458] sm:$0xff] }
  0xda   : > { %2688 = vmatprep.mubr.f32.mxu1 %v3949_v32  ;;  %3129 = vmatpush3.bf16.msra.mxu1 %v3126_v20 }
  0xdb   : > { %3131 = vmatprep.subr.bf16.mxu1 %v3130_v27  ;;  %2877 = vmatmul.mubr.f32.gmra.mrb[6].mxu0 %v3831_v39  ;;  %v3266_v39 = vpack.c.bf16 %v2199_v34, %v2198_v28  ;;  %v1639_v28 = vld [vmem:[#allocation2 + $0x4b] sm:$0xff]  ;;  %v1640_v34 = vld [vmem:[#allocation2 + $0x53] sm:$0xff] }
  0xdc   : > { %2879 = vmatprep.mubr.f32.mxu0 %v3840_v44  ;;  %3261 = vmatpush3.bf16.msra.mxu0 %v3258_v26  ;;  %v3138_v44 = vpack.c.bf16 %v2135_v40, %v2134_v38  ;;  %v4057_v38 = vld [vmem:[#allocation2] sm:$0xff] }
  0xdd   : > { %2689 = vmatmul.mubr.f32.gmra.mrb[6].mxu1 %v3959_v37  ;;  %3263 = vmatprep.subr.bf16.mxu0 %v3262_v33 }
  0xde   : > { %2691 = vmatprep.mubr.f32.mxu1 %v3969_v41  ;;  %3133 = vmatpush3.bf16.msra.mxu1 %v3130_v27  ;;  %v3306_v27 = vpack.c.bf16 %v2219_v24, %v2218_v17  ;;  %v1835_v17 = vld [vmem:[%s4098_s4] sm:$0x1] }
  0xdf   : > { %3135 = vmatprep.subr.bf16.mxu1 %v3134_v35  ;;  %2880 = vmatmul.mubr.f32.gmra.mrb[8].mxu0 %v1338_v36  ;;  %v1642_v36 = vld [vmem:[#allocation2 + $0x63] sm:$0xff] }
  0xe0   : > { %3265 = vmatpush3.bf16.msra.mxu0 %v3262_v33  ;;  %2914 = vmatprep.mubr.f32.mxu0 %v1481_v45  ;;  %v1638_v33 = vld [vmem:[#allocation2 + $0x43] sm:$0xff] }
  0xe1   : > { %2692 = vmatmul.mubr.f32.gmra.mrb[8].mxu1 %v3978_v46  ;;  %3267 = vmatprep.subr.bf16.mxu0 %v3266_v39 }
  0xe2   : > { %3137 = vmatpush3.bf16.msra.mxu1 %v3134_v35  ;;  %2726 = vmatprep.mubr.f32.mxu1 %v3899_v14  ;;  %v1487_v14 = vld [vmem:[#allocation2 + $0x4a] sm:$0xff]  ;;  %v1641_v35 = vld [vmem:[#allocation2 + $0x5b] sm:$0xff] }
  0xe3   : > { %3139 = vmatprep.subr.bf16.mxu1 %v3138_v44 }
  0xe4   : > { %3269 = vmatpush3.bf16.msra.mxu0 %v3266_v39 }
  0xe5   : > { %3271 = vmatprep.subr.bf16.mxu0 %v3270_v49 }
  0xe6   : > { %3141 = vmatpush3.bf16.msra.mxu1 %v3138_v44 }
  0xe7   : > { %3143 = vmatprep.subr.bf16.mxu1 %v3142_v52 }
  0xe8   : > { %3273 = vmatpush3.bf16.msra.mxu0 %v3270_v49 }
  0xe9   : > { %3275 = vmatprep.subr.bf16.mxu0 %v3274_v55 }
  0xea   : > { %3145 = vmatpush3.bf16.msra.mxu1 %v3142_v52 }
  0xeb   : > { %3147 = vmatprep.subr.bf16.mxu1 %v3146_v58 }
  0xec   : > { %3277 = vmatpush3.bf16.msra.mxu0 %v3274_v55 }
  0xed   : > { %3279 = vmatprep.subr.bf16.mxu0 %v3278_v59 }
  0xee   : > { %3149 = vmatpush3.bf16.msra.mxu1 %v3146_v58 }
  0xef   : > { %2915 = vmatmul.mubr.f32.vlgmr.msra.gmra.mrb[0].mxu0 %v1482_v63 }
  0xf0   : > { %2917 = vmatprep.mubr.f32.mxu0 %v1483_v4  ;;  %3281 = vmatpush3.bf16.msra.mxu0 %v3278_v59 }
  0xf1   : > { %2727 = vmatmul.mubr.f32.vlgmr.msra.gmra.mrb[0].mxu1 %v3909_v18  ;;  %3283 = vmatprep.subr.bf16.mxu0 %v3282_v62  ;;  %v2214_v18 = vld [vmem:[%s4099_s5 + $0x450] sm:$0xff] }
  0xf2   : > { %2729 = vmatprep.mubr.f32.mxu1 %v3919_v21  ;;  %v3298_v20 = vpack.c.bf16 %v2215_v19, %v2214_v18  ;;  %v2216_v21 = vld [vmem:[%s4099_s5 + $0x460] sm:$0xff] }
  0xf3   : > { %2918 = vmatmul.mubr.f32.gmra.mrb[2].mxu0 %v1484_v6  ;;  %v3302_v26 = vpack.c.bf16 %v2217_v22, %v2216_v21 }
  0xf4   : > { %2920 = vmatprep.mubr.f32.mxu0 %v1485_v2  ;;  %3285 = vmatpush3.bf16.msra.mxu0 %v3282_v62 }
  0xf5   : > { %2730 = vmatmul.mubr.f32.gmra.mrb[2].mxu1 %v3929_v25  ;;  %3287 = vmatprep.subr.bf16.mxu0 %v3286_v5  ;;  %v882_v25 = vld [vmem:[#allocation2 + $0x57] sm:$0xff] }
  0xf6   : > { %2732 = vmatprep.mubr.f32.mxu1 %v3939_v29  ;;  %v1634_v29 = vld [vmem:[#allocation2 + $0x23] sm:$0xff] }
  0xf7   : > { %2921 = vmatmul.mubr.f32.gmra.mrb[4].mxu0 %v1486_v11 }
  0xf8   : > { %2923 = vmatprep.mubr.f32.mxu0 %v1487_v14  ;;  %3289 = vmatpush3.bf16.msra.mxu0 %v3286_v5 }
  0xf9   : > { %2733 = vmatmul.mubr.f32.gmra.mrb[4].mxu1 %v3949_v32  ;;  %3291 = vmatprep.subr.bf16.mxu0 %v3290_v10  ;;  %v1637_v32 = vld [vmem:[#allocation2 + $0x3b] sm:$0xff] }
  0xfa   : > { %2735 = vmatprep.mubr.f32.mxu1 %v3959_v37  ;;  %v3446_v37 = vmov 0.0|0.0  }
  0xfb   : > { %2924 = vmatmul.mubr.f32.gmra.mrb[6].mxu0 %v1488_v1  ;;  %3310 = vmatprep.subr.bf16.mxu1 %v3446_v37 }
  0xfc   : > { %2926 = vmatprep.mubr.f32.mxu0 %v1489_v9  ;;  %3293 = vmatpush3.bf16.msra.mxu0 %v3290_v10 }
  0xfd   : > { %2736 = vmatmul.mubr.f32.gmra.mrb[6].mxu1 %v3969_v41  ;;  %3295 = vmatprep.subr.bf16.mxu0 %v3294_v16 }
  0xfe   : > { %2738 = vmatprep.mubr.f32.mxu1 %v3978_v46 }
  0xff   : > { %2927 = vmatmul.mubr.f32.gmra.mrb[8].mxu0 %v1490_v15 }
 0x100   : > { %3297 = vmatpush3.bf16.msra.mxu0 %v3294_v16  ;;  %2961 = vmatprep.mubr.f32.mxu0 %v1633_v23 }
 0x101   : > { %2739 = vmatmul.mubr.f32.gmra.mrb[8].mxu1 %v882_v25  ;;  %3299 = vmatprep.subr.bf16.mxu0 %v3298_v20 }
 0x102   : > { %2996 = vmatprep.mubr.msk.f32.mxu1 %vm3447_vm0, %v4057_v38 }
 0x104   : > { %3301 = vmatpush3.bf16.msra.mxu0 %v3298_v20 }
 0x105   : > { %3303 = vmatprep.subr.bf16.mxu0 %v3302_v26 }
 0x108   : > { %3305 = vmatpush3.bf16.msra.mxu0 %v3302_v26 }
 0x109   : > { %3307 = vmatprep.subr.bf16.mxu0 %v3306_v27 }
 0x10c   : > { %3309 = vmatpush3.bf16.msra.mxu0 %v3306_v27 }
 0x10f   : > { %2962 = vmatmul.mubr.f32.vlgmr.msra.gmra.mrb[0].mxu0 %v1634_v29 }
 0x110   : > { %2964 = vmatprep.mubr.f32.mxu0 %v1635_v30 }
 0x113   : > { %2965 = vmatmul.mubr.f32.gmra.mrb[2].mxu0 %v1636_v31 }
 0x114   : > { %2967 = vmatprep.mubr.f32.mxu0 %v1637_v32 }
 0x117   : > { %2968 = vmatmul.mubr.f32.gmra.mrb[4].mxu0 %v1638_v33 }
 0x118   : > { %2970 = vmatprep.mubr.f32.mxu0 %v1639_v28 }
 0x11b   : > { %2971 = vmatmul.mubr.f32.gmra.mrb[6].mxu0 %v1640_v34 }
 0x11c   : > { %2973 = vmatprep.mubr.f32.mxu0 %v1641_v35 }
 0x11f   : > { %2974 = vmatmul.mubr.f32.gmra.mrb[8].mxu0 %v1642_v36 }
 0x1c4   : > { %v2728_v40 = vpop.f32.mrb[0].mxu1 }
 0x1c5   : > { %v966_v41 = vpop.f32.mrb[1].mxu1 }
 0x1c8   : > { %v2731_v39 = vpop.f32.mrb[2].mxu1 }
 0x1c9   : > { %v976_v42 = vpop.f32.mrb[3].mxu1 }
 0x1cc   : > { %v2734_v43 = vpop.f32.mrb[4].mxu1 }
 0x1cd   : > { %v986_v44 = vpop.f32.mrb[5].mxu1 }
 0x1d0   : > { %v2737_v45 = vpop.f32.mrb[6].mxu1 }
 0x1d1   : > { %v996_v46 = vpop.f32.mrb[7].mxu1 }
 0x1d4   : > { %v2740_v47 = vpop.f32.mrb[8].mxu1 }
 0x1d5   : > { %v1006_v48 = vpop.f32.mrb[9].mxu1 }
 0x1e2   : > { %v2963_v49 = vpop.f32.mrb[0].mxu0 }
 0x1e3   : > { %v3340_v50 = vadd.f32 %v2963_v49, %v2728_v40  ;;  %v1726_v51 = vpop.f32.mrb[1].mxu0 }
 0x1e4   : > { %v3341_v52 = vadd.f32 %v1726_v51, %v966_v41 }
 0x1e5   : > { %v1911_v53 = vmul.f32 %v3340_v50, %v3340_v50 }
 0x1e6   : > { %v2267_v54 = vpack.c.bf16 %v3340_v50, %v3341_v52  ;;  %v1910_v55 = vmul.f32 %v3341_v52, %v3341_v52  ;;  %v2966_v56 = vpop.f32.mrb[2].mxu0 }
 0x1e7   : > { %v3342_v57 = vadd.f32 %v2966_v56, %v2731_v39  ;;  %v1736_v58 = vpop.f32.mrb[3].mxu0 }
 0x1e8   : > { %2268 = vst [vmem:[%s4066_s17] sm:$0xff] %v2267_v54   ;;  %v3326_v59 = vpack.c.bf16 %v1911_v53, %v1910_v55  ;;  %v3343_v60 = vadd.f32 %v1736_v58, %v976_v42  ;;  %3312 = vmatpush3.bf16.msra.mxu1 %v2267_v54 }
 0x1e9   : > { %v1913_v61 = vmul.f32 %v3342_v57, %v3342_v57  ;;  %3313 = vmatprep.subr.bf16.mxu1 %v3446_v37 }
 0x1ea   : > { %v2272_v62 = vpack.c.bf16 %v3342_v57, %v3343_v60  ;;  %v1912_v63 = vmul.f32 %v3343_v60, %v3343_v60  ;;  %v2969_v0 = vpop.f32.mrb[4].mxu0 }
 0x1eb   : > { %v3344_v3 = vadd.f32 %v2969_v0, %v2734_v43  ;;  %v1746_v4 = vpop.f32.mrb[5].mxu0 }
 0x1ec   : > { %2293 = vst [vmem:[%s4066_s17 + $0x8] sm:$0xff] %v2272_v62   ;;  %v3329_v5 = vpack.c.bf16 %v1913_v61, %v1912_v63  ;;  %v3345_v6 = vadd.f32 %v1746_v4, %v986_v44  ;;  %3315 = vmatpush3.bf16.msra.mxu1 %v2272_v62 }
 0x1ed   : > { %v1915_v7 = vmul.f32 %v3344_v3, %v3344_v3  ;;  %3316 = vmatprep.subr.bf16.mxu1 %v3446_v37 }
 0x1ee   : > { %v2277_v8 = vpack.c.bf16 %v3344_v3, %v3345_v6  ;;  %v1914_v2 = vmul.f32 %v3345_v6, %v3345_v6  ;;  %v2972_v10 = vpop.f32.mrb[6].mxu0 }
 0x1ef   : > { %v3346_v11 = vadd.f32 %v2972_v10, %v2737_v45  ;;  %v1756_v12 = vpop.f32.mrb[7].mxu0 }
 0x1f0   : > { %2294 = vst [vmem:[%s4066_s17 + $0x10] sm:$0xff] %v2277_v8   ;;  %v3332_v13 = vpack.c.bf16 %v1915_v7, %v1914_v2  ;;  %v3347_v14 = vadd.f32 %v1756_v12, %v996_v46  ;;  %3318 = vmatpush3.bf16.msra.mxu1 %v2277_v8 }
 0x1f1   : > { %v1917_v16 = vmul.f32 %v3346_v11, %v3346_v11  ;;  %3319 = vmatprep.subr.bf16.mxu1 %v3446_v37 }
 0x1f2   : > { %v2282_v1 = vpack.c.bf16 %v3346_v11, %v3347_v14  ;;  %v1916_v18 = vmul.f32 %v3347_v14, %v3347_v14  ;;  %v2975_v19 = vpop.f32.mrb[8].mxu0 }
 0x1f3   : > { %v3348_v9 = vadd.f32 %v2975_v19, %v2740_v47  ;;  %v1766_v15 = vpop.f32.mrb[9].mxu0 }
 0x1f4   : > { %2295 = vst [vmem:[%s4066_s17 + $0x18] sm:$0xff] %v2282_v1   ;;  %v3335_v20 = vpack.c.bf16 %v1917_v16, %v1916_v18  ;;  %v3349_v21 = vadd.f32 %v1766_v15, %v1006_v48  ;;  %3321 = vmatpush3.bf16.msra.mxu1 %v2282_v1 }
 0x1f5   : > { %v1919_v22 = vmul.f32 %v3348_v9, %v3348_v9  ;;  %3322 = vmatprep.subr.bf16.mxu1 %v3446_v37 }
 0x1f6   : > { %v2287_v23 = vpack.c.bf16 %v3348_v9, %v3349_v21  ;;  %v1918_v25 = vmul.f32 %v3349_v21, %v3349_v21 }
 0x1f8   : > { %2296 = vst [vmem:[%s4066_s17 + $0x20] sm:$0xff] %v2287_v23   ;;  %v3338_v26 = vpack.c.bf16 %v1919_v22, %v1918_v25  ;;  %3324 = vmatpush3.bf16.msra.mxu1 %v2287_v23 }
 0x1f9   : > { %3325 = vmatprep.subr.bf16.mxu1 %v3446_v37 }
 0x1fb   : > { %2997 = vmatmul.mubr.msk.f32.vlgmr.msra.gmra.mrb[10].mxu1 %vm1836_vm1, %v1835_v17 }
 0x1fc   : > { %3327 = vmatpush3.bf16.msra.mxu1 %v3326_v59  ;;  %3019 = vmatprep.mubr.msk.f32.mxu1 %vm3447_vm0, %v4057_v38 }
 0x1fd   : > { %3328 = vmatprep.subr.bf16.mxu1 %v3446_v37 }
 0x200   : > { %3330 = vmatpush3.bf16.msra.mxu1 %v3329_v5 }
 0x201   : > { %3331 = vmatprep.subr.bf16.mxu1 %v3446_v37 }
 0x204   : > { %3333 = vmatpush3.bf16.msra.mxu1 %v3332_v13 }
 0x205   : > { %3334 = vmatprep.subr.bf16.mxu1 %v3446_v37 }
 0x208   : > { %3336 = vmatpush3.bf16.msra.mxu1 %v3335_v20 }
 0x209   : > { %3337 = vmatprep.subr.bf16.mxu1 %v3446_v37 }
 0x20c   : > { %3339 = vmatpush3.bf16.msra.mxu1 %v3338_v26 }
 0x20f   : > { %3020 = vmatmul.mubr.msk.f32.vlgmr.msra.gmra.mrb[12].mxu1 %vm1836_vm1, %v1835_v17 }
 0x2ce   : > { %v1906_v24 = vpop.f32.mrb[10].mxu1 }
 0x2cf   : > { %v2998_v27 = vpop.f32.mrb[11].mxu1 }
 0x2e2   : > { %v1986_v29 = vpop.f32.mrb[12].mxu1 }
 0x2e3   : > { %v1991_v30 = vrot.slane %v1986_v29, 7  ;;  %v3021_v31 = vpop.f32.mrb[13].mxu1 }
 0x2e5   : > { %v1994_v32 = vsel %vm1993_vm2, %v1906_v24, %v1991_v30 }
 0x2e6   : > { %1995 = vst [vmem:[%s289_s22] sm:$0x3] %v1994_v32 }
 0x2e7 PF: > { %s18_s24 = sadd.s32 1, %s3442_s24  }
 0x2e8   : > { %p15_p4 = scmp.ge.s32.totalorder %s18_s24, 4  }
 0x2ea   :  { %17 = sbr.rel (!%p15_p4) target bundleno = 1 (0x1), region = 94 }

</bundles_post_ra>
